<compile_context>
chip_gen: v7x
topology: tpu7x:2x2x1
jax: 0.10.0
libtpu: 0.0.40
codegen_flags: <defaults>
</compile_context>

<pallas_src>
import functools

import jax
import jax.numpy as jnp
from jax import lax
from jax.experimental import pallas as pl
from jax.experimental.pallas import tpu as pltpu


# ----------------------------------------------------------------------------
# Phase A kernel: conv5 + enc-conv + Encoding accumulation, finalize on last
# spatial tile (BN1d + mean_K + fc/sigmoid + selayer).
# ----------------------------------------------------------------------------
def enc_head_phase_a_kernel(
    x_ref,                        # (1, Cin, TN)  compute dtype
    w5_ref, s5_ref, b5_ref,       # (C, Cin) cd, (C, 1) f32, (C, 1) f32
    we_ref, es_ref, eb_ref,       # (C, C)  cd, (C, 1) f32, (C, 1) f32
    cws_ref, s2_ref, s2cn_ref,    # (K, C)  cd (s^2-folded codewords), (K,1), (K,1)
    cw_ref,                       # (K, C)  f32 (unscaled codewords, E correction)
    b1s_ref, b1b_ref,             # (K, 1) f32, (K, 1) f32
    wfc_ref, bfc_ref,             # (C, C)  cd, (1, C) f32
    wse_ref, bse_ref,             # (C, nclass) cd, (1, nclass) f32
    feat_ref,                     # out: (1, C, TN) compute dtype
    gamma_ref,                    # out: (1, 1, C)  f32
    se_ref,                       # out: (1, 1, nclass) f32
    e_acc, a_acc,                 # scratch: (K, C) f32, (K, 1) f32
):
    n_idx = pl.program_id(1)
    cd = w5_ref.dtype                       # MXU compute dtype (f32 or bf16)
    use_approx = (w5_ref.dtype != jnp.float32)

    @pl.when(n_idx == 0)
    def _init():
        e_acc[...] = jnp.zeros_like(e_acc)
        a_acc[...] = jnp.zeros_like(a_acc)

    # --- conv5: 1x1 conv (no bias) + folded BN + ReLU (channel-major) -------
    xt = x_ref[0]                                                   # (Cin, TN)
    feat = lax.dot_general(w5_ref[...], xt, (((1,), (0,)), ((), ())),
                           preferred_element_type=jnp.float32)      # (C, TN)
    feat = jnp.maximum(feat * s5_ref[...] + b5_ref[...], 0.0)
    feat_c = feat.astype(cd)
    feat_ref[0] = feat_c                                            # lane-dense store

    # --- encmodule.encoding[0:3]: 1x1 conv + folded BN + ReLU ---------------
    x1 = lax.dot_general(we_ref[...], feat_c, (((1,), (0,)), ((), ())),
                         preferred_element_type=jnp.float32)        # (C, TN)
    x1 = jnp.maximum(x1 * es_ref[...] + eb_ref[...], 0.0)
    x1_c = x1.astype(cd)

    # --- Encoding soft assignment (softmax over K along sublanes) -----------
    xn = jnp.sum(x1 * x1, axis=0, keepdims=True)                    # (1, TN) f32
    xc = lax.dot_general(cws_ref[...], x1_c, (((1,), (0,)), ((), ())),
                         preferred_element_type=jnp.float32)        # (K, TN)
    # SL[k,n] = s_k^2 * (||x_n||^2 + ||c_k||^2 - 2 x_n.c_k)  (s^2 pre-folded)
    sl = s2_ref[...] * xn + s2cn_ref[...] - 2.0 * xc                # (K, TN)
    sl = sl - jnp.max(sl, axis=0, keepdims=True)
    p = jnp.exp(sl)
    a = p * pl.reciprocal(jnp.sum(p, axis=0, keepdims=True), approx=use_approx)

    # --- accumulate E_pre[k,d] = sum_n a[k,n] x1[d,n] and asum[k] -----------
    e_acc[...] += lax.dot_general(a.astype(cd), x1_c, (((1,), (1,)), ((), ())),
                                  preferred_element_type=jnp.float32)   # (K, C)
    a_acc[...] += jnp.sum(a, axis=1, keepdims=True)                 # (K, 1), XLU

    # --- finalize once per batch element, on the last spatial tile ----------
    @pl.when(n_idx == pl.num_programs(1) - 1)
    def _finalize():
        e = e_acc[...] - a_acc[...] * cw_ref[...]                   # (K, C)
        e = jnp.maximum(e * b1s_ref[...] + b1b_ref[...], 0.0)       # BN1d + ReLU
        en = jnp.mean(e, axis=0, keepdims=True)                     # (1, C)
        en_c = en.astype(cd)
        g = jnp.dot(en_c, wfc_ref[...],
                    preferred_element_type=jnp.float32) + bfc_ref[...]
        gamma_ref[0] = jax.nn.sigmoid(g)                            # (1, C)
        se_ref[0] = (jnp.dot(en_c, wse_ref[...],
                             preferred_element_type=jnp.float32)
                     + bse_ref[...])                                # (1, nclass)


# ----------------------------------------------------------------------------
# Phase B kernel: out = conv6(feat * (1 + gamma)), stored transposed so the
# narrow-nclass output is lane-dense (last dim = spatial tile).
# ----------------------------------------------------------------------------
def enc_head_phase_b_kernel(feat_ref, gamma_ref, w6_ref, b6_ref, out_ref):
    cd = w6_ref.dtype
    feat = feat_ref[0].astype(jnp.float32)                          # (C, TN)
    # F.relu_(x + x*gamma): ReLU is an identity (feat >= 0, 1 + sigmoid > 0),
    # so it is dropped (saves a full (C, TN) VPU pass).
    y = feat * (1.0 + gamma_ref[0])                                 # (C, TN)
    out = lax.dot_general(w6_ref[...], y.astype(cd), (((1,), (0,)), ((), ())),
                          preferred_element_type=jnp.float32)       # (nclass, TN)
    out_ref[0] = out + b6_ref[...]                                  # lane-dense store


# ----------------------------------------------------------------------------
# Wrapper
# ----------------------------------------------------------------------------
def enc_head_forward(x_nchw, params, *, tile_n=512, compute_dtype=jnp.float32):
    """EncHead forward. Returns (class-score map NCHW, se logits (B, nclass))."""
    B, Cin, H, W = x_nchw.shape
    N = H * W
    C = params["w5"].shape[1]
    K = params["codewords"].shape[0]
    nclass = params["w6"].shape[1]
    f32 = jnp.float32
    cd = compute_dtype

    # spatial tile: lane-aligned divisor of N, else fall back to one tile/image
    tile_n = min(tile_n, N)
    if N % tile_n != 0 or tile_n % 128 != 0:
        tile_n = N
    nt = N // tile_n

    # ---- layout / folding glue (done once, outside the grid loops) ---------
    x = x_nchw.reshape(B, Cin, N).astype(cd)                # NCHW -> (B,Cin,N): reshape only
    w5t = params["w5"].T.astype(cd)                         # (C, Cin)
    s5 = params["bn5_s"].reshape(C, 1).astype(f32)
    b5 = params["bn5_b"].reshape(C, 1).astype(f32)
    wet = params["we"].T.astype(cd)                         # (C, C)
    es = params["bne_s"].reshape(C, 1).astype(f32)
    eb = params["bne_b"].reshape(C, 1).astype(f32)
    cw = params["codewords"].astype(f32)                    # (K, C)
    s2 = (params["enc_scale"].astype(f32) ** 2).reshape(K, 1)
    cn = jnp.sum(cw * cw, axis=1, keepdims=True)            # (K, 1)
    cws = (s2 * cw).astype(cd)                              # s^2-folded codewords
    s2cn = s2 * cn                                          # (K, 1)
    b1s = params["bn1_s"].reshape(K, 1).astype(f32)
    b1b = params["bn1_b"].reshape(K, 1).astype(f32)
    wfc = params["wfc"].astype(cd)                          # (C, C)   (in, out)
    bfc = params["bfc"].reshape(1, C).astype(f32)
    wse = params["wse"].astype(cd)                          # (C, nclass)
    bse = params["bse"].reshape(1, nclass).astype(f32)
    w6t = params["w6"].T.astype(cd)                         # (nclass, C)
    b6c = params["b6"].reshape(nclass, 1).astype(f32)

    # Weight blocks use a constant index_map (0,0): fetched once, stays resident.
    wspec = lambda shape: pl.BlockSpec(shape, lambda b, n: (0, 0))
    VMEM_LIMIT = 48 * 1024 * 1024   # safe on v5e/v6e (128 MiB) and v7x (64 MiB)

    # ---- Phase A ------------------------------------------------------------
    grid_a = pltpu.PrefetchScalarGridSpec(
        num_scalar_prefetch=0,
        grid=(B, nt),                              # N tiles innermost = reduction
        in_specs=[
            pl.BlockSpec((1, Cin, tile_n), lambda b, n: (b, 0, n)),
            wspec((C, Cin)), wspec((C, 1)), wspec((C, 1)),
            wspec((C, C)), wspec((C, 1)), wspec((C, 1)),
            wspec((K, C)), wspec((K, 1)), wspec((K, 1)),
            wspec((K, C)),
            wspec((K, 1)), wspec((K, 1)),
            wspec((C, C)), wspec((1, C)),
            wspec((C, nclass)), wspec((1, nclass)),
        ],
        out_specs=[
            pl.BlockSpec((1, C, tile_n), lambda b, n: (b, 0, n)),
            pl.BlockSpec((1, 1, C), lambda b, n: (b, 0, 0)),
            pl.BlockSpec((1, 1, nclass), lambda b, n: (b, 0, 0)),
        ],
        scratch_shapes=[pltpu.VMEM((K, C), jnp.float32),
                        pltpu.VMEM((K, 1), jnp.float32)],
    )
    feat, gamma, se = pl.pallas_call(
        enc_head_phase_a_kernel,
        out_shape=(jax.ShapeDtypeStruct((B, C, N), cd),
                   jax.ShapeDtypeStruct((B, 1, C), jnp.float32),
                   jax.ShapeDtypeStruct((B, 1, nclass), jnp.float32)),
        grid_spec=grid_a,
        compiler_params=pltpu.CompilerParams(
            dimension_semantics=("parallel", "arbitrary"),
            vmem_limit_bytes=VMEM_LIMIT),
    )(x, w5t, s5, b5, wet, es, eb, cws, s2, s2cn, cw, b1s, b1b,
      wfc, bfc, wse, bse)

    # tiny glue: gamma row (B,1,C) -> column (B,C,1) for channel-major phase B
    gamma_col = gamma.reshape(B, C, 1)

    # ---- Phase B ------------------------------------------------------------
    grid_b = pltpu.PrefetchScalarGridSpec(
        num_scalar_prefetch=0,
        grid=(B, nt),
        in_specs=[
            pl.BlockSpec((1, C, tile_n), lambda b, n: (b, 0, n)),
            pl.BlockSpec((1, C, 1), lambda b, n: (b, 0, 0)),
            wspec((nclass, C)), wspec((nclass, 1)),
        ],
        out_specs=pl.BlockSpec((1, nclass, tile_n), lambda b, n: (b, 0, n)),
    )
    out = pl.pallas_call(
        enc_head_phase_b_kernel,
        out_shape=jax.ShapeDtypeStruct((B, nclass, N), jnp.float32),
        grid_spec=grid_b,
        compiler_params=pltpu.CompilerParams(
            dimension_semantics=("parallel", "parallel"),
            vmem_limit_bytes=VMEM_LIMIT),
    )(feat, gamma_col, w6t, b6c)

    # (B, nclass, N) is NCHW after a reshape -- no output transpose needed.
    return out.reshape(B, nclass, H, W), se.reshape(B, nclass)


# ----------------------------------------------------------------------------
# Pure-JAX reference (mirrors the PyTorch forward, eval-mode BN/dropout)
# ----------------------------------------------------------------------------
def enc_head_reference(x_nchw, params):
    B, Cin, H, W = x_nchw.shape
    N = H * W
    x = jnp.transpose(x_nchw, (0, 2, 3, 1)).reshape(B, N, Cin)
    feat = jnp.maximum(x @ params["w5"] * params["bn5_s"] + params["bn5_b"], 0.0)
    x1 = jnp.maximum(feat @ params["we"] * params["bne_s"] + params["bne_b"], 0.0)
    cw = params["codewords"]
    s = params["enc_scale"]
    diff = x1[:, :, None, :] - cw[None, None, :, :]                 # (B,N,K,C)
    sl = jnp.sum((s[None, None, :, None] * diff) ** 2, axis=-1)     # (B,N,K)
    a = jax.nn.softmax(sl, axis=2)
    e = jnp.sum(a[..., None] * diff, axis=1)                        # (B,K,C)
    e = jnp.maximum(e * params["bn1_s"][None] + params["bn1_b"][None], 0.0)
    en = jnp.mean(e, axis=1)                                        # (B,C)
    gamma = jax.nn.sigmoid(en @ params["wfc"] + params["bfc"])
    se_out = en @ params["wse"] + params["bse"]
    y = jnp.maximum(feat * (1.0 + gamma[:, None, :]), 0.0)
    out = y @ params["w6"] + params["b6"]
    nclass = out.shape[-1]
    return jnp.transpose(out.reshape(B, H, W, nclass), (0, 3, 1, 2)), se_out


# ----------------------------------------------------------------------------
# Deterministic parameter init (shapes per EncHead.__init__, scaled down)
# ----------------------------------------------------------------------------
def init_params(key, cin, c, k, nclass, eps=1e-5):
    ks = jax.random.split(key, 16)
    std1 = 1.0 / (k * c) ** 0.5

    def bn_fold(gamma, beta):
        # running_mean = 0, running_var = 1 (inference fold)
        scale = gamma / jnp.sqrt(1.0 + eps)
        bias = beta
        return scale, bias

    bn5_s, bn5_b = bn_fold(1.0 + 0.1 * jax.random.normal(ks[1], (1, c)),
                           0.05 * jax.random.normal(ks[2], (1, c)))
    bne_s, bne_b = bn_fold(1.0 + 0.1 * jax.random.normal(ks[4], (1, c)),
                           0.05 * jax.random.normal(ks[5], (1, c)))
    bn1_s, bn1_b = bn_fold(1.0 + 0.1 * jax.random.normal(ks[8], (k, 1)),
                           0.05 * jax.random.normal(ks[9], (k, 1)))
    return {
        # conv5: Conv2d(cin, c, 1, bias=False) folded with BN(c)
        "w5": 0.1 * jax.random.normal(ks[0], (cin, c), jnp.float32),
        "bn5_s": bn5_s.astype(jnp.float32), "bn5_b": bn5_b.astype(jnp.float32),
        # encmodule.encoding[0]: Conv2d(c, c, 1, bias=False) + BN(c)
        "we": 0.05 * jax.random.normal(ks[3], (c, c), jnp.float32),
        "bne_s": bne_s.astype(jnp.float32), "bne_b": bne_b.astype(jnp.float32),
        # Encoding(D=c, K=k)
        "codewords": jax.random.uniform(ks[6], (k, c), jnp.float32, -std1, std1),
        "enc_scale": jax.random.uniform(ks[7], (k,), jnp.float32, -1.0, 0.0),
        # BatchNorm1d(k)
        "bn1_s": bn1_s.astype(jnp.float32), "bn1_b": bn1_b.astype(jnp.float32),
        # fc: Linear(c, c) (weights stored (in, out))
        "wfc": 0.05 * jax.random.normal(ks[10], (c, c), jnp.float32),
        "bfc": 0.05 * jax.random.normal(ks[11], (1, c), jnp.float32),
        # selayer: Linear(c, nclass)
        "wse": 0.05 * jax.random.normal(ks[12], (c, nclass), jnp.float32),
        "bse": 0.05 * jax.random.normal(ks[13], (1, nclass), jnp.float32),
        # conv6: Conv2d(c, nclass, 1) with bias (dropout is eval-identity)
        "w6": 0.05 * jax.random.normal(ks[14], (c, nclass), jnp.float32),
        "b6": 0.05 * jax.random.normal(ks[15], (1, nclass), jnp.float32),
    }


if __name__ == "__main__":
    # Small shapes (module's 512 channels scaled to 128; ncodes kept at 32).
    B, Cin, H, W = 2, 64, 16, 16
    C, K, NCLASS = 128, 32, 8

    key = jax.random.PRNGKey(0)
    kx, kp = jax.random.split(key)
    x = jax.random.normal(kx, (B, Cin, H, W), jnp.float32)
    params = init_params(kp, Cin, C, K, NCLASS)

    ref0, ref_se = enc_head_reference(x, params)

    # f32 MXU path (tight check against the pure-JAX reference).
    # tile_n=128 -> 2 spatial tiles, so the E-accumulation/finalize path is
    # actually exercised across grid steps.
    fwd_f32 = jax.jit(functools.partial(enc_head_forward, tile_n=128,
                                        compute_dtype=jnp.float32))
    out0, se = jax.block_until_ready(fwd_f32(x, params))
    assert out0.shape == (B, NCLASS, H, W) and se.shape == (B, NCLASS)
    assert jnp.allclose(out0, ref0, rtol=2e-3, atol=2e-3)
    assert jnp.allclose(se, ref_se, rtol=2e-3, atol=2e-3)

    # bf16 MXU path (v6e/v7x perf mode): f32 accumulation, looser tolerance
    # against the f32 reference.
    fwd_bf16 = jax.jit(functools.partial(enc_head_forward, tile_n=128,
                                         compute_dtype=jnp.bfloat16))
    out0_b, se_b = jax.block_until_ready(fwd_bf16(x, params))
    assert jnp.allclose(out0_b, ref0, rtol=2e-2, atol=2e-2)
    assert jnp.allclose(se_b, ref_se, rtol=2e-2, atol=2e-2)

    print("KERNEL_OK")
</pallas_src>

<mosaic_0001>
module attributes {stable_mosaic.version = 11 : i64} {
  func.func @enc_head_phase_a_kernel(%arg0: i32, %arg1: i32, %arg2: memref<1x64x128xf32, #tpu.memory_space<vmem>>, %arg3: memref<128x64xf32, #tpu.memory_space<vmem>>, %arg4: memref<128x1xf32, #tpu.memory_space<vmem>>, %arg5: memref<128x1xf32, #tpu.memory_space<vmem>>, %arg6: memref<128x128xf32, #tpu.memory_space<vmem>>, %arg7: memref<128x1xf32, #tpu.memory_space<vmem>>, %arg8: memref<128x1xf32, #tpu.memory_space<vmem>>, %arg9: memref<32x128xf32, #tpu.memory_space<vmem>>, %arg10: memref<32x1xf32, #tpu.memory_space<vmem>>, %arg11: memref<32x1xf32, #tpu.memory_space<vmem>>, %arg12: memref<32x128xf32, #tpu.memory_space<vmem>>, %arg13: memref<32x1xf32, #tpu.memory_space<vmem>>, %arg14: memref<32x1xf32, #tpu.memory_space<vmem>>, %arg15: memref<128x128xf32, #tpu.memory_space<vmem>>, %arg16: memref<1x128xf32, #tpu.memory_space<vmem>>, %arg17: memref<128x8xf32, #tpu.memory_space<vmem>>, %arg18: memref<1x8xf32, #tpu.memory_space<vmem>>, %arg19: memref<1x128x128xf32, #tpu.memory_space<vmem>>, %arg20: memref<1x1x128xf32, #tpu.memory_space<vmem>>, %arg21: memref<1x1x8xf32, #tpu.memory_space<vmem>>, %arg22: memref<32x128xf32, #tpu.memory_space<vmem>>, %arg23: memref<32x1xf32, #tpu.memory_space<vmem>>) attributes {dimension_semantics = [#tpu.dimension_semantics<parallel>, #tpu.dimension_semantics<arbitrary>], iteration_bounds = array<i64: 2, 2>, scalar_prefetch = 0 : i64, scratch_operands = 2 : i64, tpu.core_type = #tpu.core_type<tc>, window_params = [{transform_indices = @transform_0, window_bounds = array<i64: 1, 64, 128>}, {pipeline_mode = #tpu.pipeline_mode<synchronous>, transform_indices = @transform_1, window_bounds = array<i64: 128, 64>}, {pipeline_mode = #tpu.pipeline_mode<synchronous>, transform_indices = @transform_2, window_bounds = array<i64: 128, 1>}, {pipeline_mode = #tpu.pipeline_mode<synchronous>, transform_indices = @transform_3, window_bounds = array<i64: 128, 1>}, {pipeline_mode = #tpu.pipeline_mode<synchronous>, transform_indices = @transform_4, window_bounds = array<i64: 128, 128>}, {pipeline_mode = #tpu.pipeline_mode<synchronous>, transform_indices = @transform_5, window_bounds = array<i64: 128, 1>}, {pipeline_mode = #tpu.pipeline_mode<synchronous>, transform_indices = @transform_6, window_bounds = array<i64: 128, 1>}, {pipeline_mode = #tpu.pipeline_mode<synchronous>, transform_indices = @transform_7, window_bounds = array<i64: 32, 128>}, {pipeline_mode = #tpu.pipeline_mode<synchronous>, transform_indices = @transform_8, window_bounds = array<i64: 32, 1>}, {pipeline_mode = #tpu.pipeline_mode<synchronous>, transform_indices = @transform_9, window_bounds = array<i64: 32, 1>}, {pipeline_mode = #tpu.pipeline_mode<synchronous>, transform_indices = @transform_10, window_bounds = array<i64: 32, 128>}, {pipeline_mode = #tpu.pipeline_mode<synchronous>, transform_indices = @transform_11, window_bounds = array<i64: 32, 1>}, {pipeline_mode = #tpu.pipeline_mode<synchronous>, transform_indices = @transform_12, window_bounds = array<i64: 32, 1>}, {pipeline_mode = #tpu.pipeline_mode<synchronous>, transform_indices = @transform_13, window_bounds = array<i64: 128, 128>}, {pipeline_mode = #tpu.pipeline_mode<synchronous>, transform_indices = @transform_14, window_bounds = array<i64: 1, 128>}, {pipeline_mode = #tpu.pipeline_mode<synchronous>, transform_indices = @transform_15, window_bounds = array<i64: 128, 8>}, {pipeline_mode = #tpu.pipeline_mode<synchronous>, transform_indices = @transform_16, window_bounds = array<i64: 1, 8>}, {transform_indices = @transform_17, window_bounds = array<i64: 1, 128, 128>}, {transform_indices = @transform_18, window_bounds = array<i64: 1, 1, 128>}, {transform_indices = @transform_19, window_bounds = array<i64: 1, 1, 8>}]} {
    %c0_i32 = arith.constant 0 : i32
    %0 = arith.cmpi eq, %arg1, %c0_i32 : i32
    %1 = arith.extui %0 : i1 to i32
    %c0_i32_0 = arith.constant 0 : i32
    %2 = arith.cmpi ne, %1, %c0_i32_0 : i32
    scf.if %2 {
      %cst_43 = arith.constant 0.000000e+00 : f32
      %65 = vector.broadcast %cst_43 : f32 to vector<32x128xf32>
      %c0_44 = arith.constant 0 : index
      %c0_45 = arith.constant 0 : index
      %66 = vector.load %arg22[%c0_44, %c0_45] : memref<32x128xf32, #tpu.memory_space<vmem>>, vector<32x128xf32>
      tpu.vector_store %arg22[%c0_44, %c0_45], %65 {strides = array<i32>} : memref<32x128xf32, #tpu.memory_space<vmem>>, vector<32x128xf32>,
      %cst_46 = arith.constant 0.000000e+00 : f32
      %67 = vector.broadcast %cst_46 : f32 to vector<32x1xf32>
      %c0_47 = arith.constant 0 : index
      %c0_48 = arith.constant 0 : index
      %68 = vector.load %arg23[%c0_47, %c0_48] : memref<32x1xf32, #tpu.memory_space<vmem>>, vector<32x1xf32>
      tpu.vector_store %arg23[%c0_47, %c0_48], %67 {strides = array<i32>} : memref<32x1xf32, #tpu.memory_space<vmem>>, vector<32x1xf32>,
    } else {
    }
    %c0 = arith.constant 0 : index
    %c0_1 = arith.constant 0 : index
    %c0_2 = arith.constant 0 : index
    %3 = vector.load %arg2[%c0, %c0_1, %c0_2] : memref<1x64x128xf32, #tpu.memory_space<vmem>>, vector<1x64x128xf32>
    %4 = vector.shape_cast %3 : vector<1x64x128xf32> to vector<64x128xf32>
    %c0_3 = arith.constant 0 : index
    %c0_4 = arith.constant 0 : index
    %5 = vector.load %arg3[%c0_3, %c0_4] : memref<128x64xf32, #tpu.memory_space<vmem>>, vector<128x64xf32>
    %cst = arith.constant dense<0.000000e+00> : vector<128x128xf32>
    %6 = tpu.matmul %5, %4, %cst {dimension_numbers = #tpu.dot_dimension_numbers<[1], [0], [0], [1], [0, 0, 1, 1], [], []>} : vector<128x64xf32>, vector<64x128xf32>, vector<128x128xf32> -> vector<128x128xf32>
    %c0_5 = arith.constant 0 : index
    %c0_6 = arith.constant 0 : index
    %7 = vector.load %arg4[%c0_5, %c0_6] : memref<128x1xf32, #tpu.memory_space<vmem>>, vector<128x1xf32>
    %8 = vector.broadcast %7 : vector<128x1xf32> to vector<128x128xf32>
    %9 = arith.mulf %6, %8 : vector<128x128xf32>
    %c0_7 = arith.constant 0 : index
    %c0_8 = arith.constant 0 : index
    %10 = vector.load %arg5[%c0_7, %c0_8] : memref<128x1xf32, #tpu.memory_space<vmem>>, vector<128x1xf32>
    %11 = vector.broadcast %10 : vector<128x1xf32> to vector<128x128xf32>
    %12 = arith.addf %9, %11 : vector<128x128xf32>
    %cst_9 = arith.constant 0.000000e+00 : f32
    %13 = vector.broadcast %cst_9 : f32 to vector<128x128xf32>
    %14 = arith.maximumf %12, %13 : vector<128x128xf32>
    %c0_10 = arith.constant 0 : index
    %c0_11 = arith.constant 0 : index
    %c0_12 = arith.constant 0 : index
    %15 = vector.load %arg19[%c0_10, %c0_11, %c0_12] : memref<1x128x128xf32, #tpu.memory_space<vmem>>, vector<1x128x128xf32>
    %16 = vector.shape_cast %15 : vector<1x128x128xf32> to vector<128x128xf32>
    %17 = vector.shape_cast %14 : vector<128x128xf32> to vector<1x128x128xf32>
    tpu.vector_store %arg19[%c0_10, %c0_11, %c0_12], %17 {strides = array<i32>} : memref<1x128x128xf32, #tpu.memory_space<vmem>>, vector<1x128x128xf32>,
    %c0_13 = arith.constant 0 : index
    %c0_14 = arith.constant 0 : index
    %18 = vector.load %arg6[%c0_13, %c0_14] : memref<128x128xf32, #tpu.memory_space<vmem>>, vector<128x128xf32>
    %cst_15 = arith.constant dense<0.000000e+00> : vector<128x128xf32>
    %19 = tpu.matmul %18, %14, %cst_15 {dimension_numbers = #tpu.dot_dimension_numbers<[1], [0], [0], [1], [0, 0, 1, 1], [], []>} : vector<128x128xf32>, vector<128x128xf32>, vector<128x128xf32> -> vector<128x128xf32>
    %c0_16 = arith.constant 0 : index
    %c0_17 = arith.constant 0 : index
    %20 = vector.load %arg7[%c0_16, %c0_17] : memref<128x1xf32, #tpu.memory_space<vmem>>, vector<128x1xf32>
    %21 = vector.broadcast %20 : vector<128x1xf32> to vector<128x128xf32>
    %22 = arith.mulf %19, %21 : vector<128x128xf32>
    %c0_18 = arith.constant 0 : index
    %c0_19 = arith.constant 0 : index
    %23 = vector.load %arg8[%c0_18, %c0_19] : memref<128x1xf32, #tpu.memory_space<vmem>>, vector<128x1xf32>
    %24 = vector.broadcast %23 : vector<128x1xf32> to vector<128x128xf32>
    %25 = arith.addf %22, %24 : vector<128x128xf32>
    %cst_20 = arith.constant 0.000000e+00 : f32
    %26 = vector.broadcast %cst_20 : f32 to vector<128x128xf32>
    %27 = arith.maximumf %25, %26 : vector<128x128xf32>
    %28 = arith.mulf %27, %27 : vector<128x128xf32>
    %cst_21 = arith.constant dense<0.000000e+00> : vector<128xf32>
    %29 = vector.multi_reduction <add>, %28, %cst_21 [0] : vector<128x128xf32> to vector<128xf32>
    %30 = vector.shape_cast %29 : vector<128xf32> to vector<1x128xf32>
    %c0_22 = arith.constant 0 : index
    %c0_23 = arith.constant 0 : index
    %31 = vector.load %arg9[%c0_22, %c0_23] : memref<32x128xf32, #tpu.memory_space<vmem>>, vector<32x128xf32>
    %cst_24 = arith.constant dense<0.000000e+00> : vector<32x128xf32>
    %32 = tpu.matmul %31, %27, %cst_24 {dimension_numbers = #tpu.dot_dimension_numbers<[1], [0], [0], [1], [0, 0, 1, 1], [], []>} : vector<32x128xf32>, vector<128x128xf32>, vector<32x128xf32> -> vector<32x128xf32>
    %c0_25 = arith.constant 0 : index
    %c0_26 = arith.constant 0 : index
    %33 = vector.load %arg10[%c0_25, %c0_26] : memref<32x1xf32, #tpu.memory_space<vmem>>, vector<32x1xf32>
    %34 = vector.broadcast %33 : vector<32x1xf32> to vector<32x128xf32>
    %35 = vector.broadcast %30 : vector<1x128xf32> to vector<32x128xf32>
    %36 = arith.mulf %34, %35 : vector<32x128xf32>
    %c0_27 = arith.constant 0 : index
    %c0_28 = arith.constant 0 : index
    %37 = vector.load %arg11[%c0_27, %c0_28] : memref<32x1xf32, #tpu.memory_space<vmem>>, vector<32x1xf32>
    %38 = vector.broadcast %37 : vector<32x1xf32> to vector<32x128xf32>
    %39 = arith.addf %36, %38 : vector<32x128xf32>
    %cst_29 = arith.constant 2.000000e+00 : f32
    %40 = vector.broadcast %cst_29 : f32 to vector<32x128xf32>
    %41 = arith.mulf %40, %32 : vector<32x128xf32>
    %42 = arith.subf %39, %41 : vector<32x128xf32>
    %cst_30 = arith.constant dense<0xFF800000> : vector<128xf32>
    %43 = vector.multi_reduction <maximumf>, %42, %cst_30 [0] : vector<32x128xf32> to vector<128xf32>
    %44 = vector.shape_cast %43 : vector<128xf32> to vector<1x128xf32>
    %45 = vector.broadcast %44 : vector<1x128xf32> to vector<32x128xf32>
    %46 = arith.subf %42, %45 : vector<32x128xf32>
    %47 = math.exp %46 : vector<32x128xf32>
    %cst_31 = arith.constant dense<0.000000e+00> : vector<128xf32>
    %48 = vector.multi_reduction <add>, %47, %cst_31 [0] : vector<32x128xf32> to vector<128xf32>
    %49 = vector.shape_cast %48 : vector<128xf32> to vector<1x128xf32>
    %50 = tpu.reciprocal %49 : vector<1x128xf32> -> vector<1x128xf32>
    %51 = vector.broadcast %50 : vector<1x128xf32> to vector<32x128xf32>
    %52 = arith.mulf %47, %51 : vector<32x128xf32>
    %c0_32 = arith.constant 0 : index
    %c0_33 = arith.constant 0 : index
    %53 = vector.load %arg22[%c0_32, %c0_33] : memref<32x128xf32, #tpu.memory_space<vmem>>, vector<32x128xf32>
    %cst_34 = arith.constant dense<0.000000e+00> : vector<32x128xf32>
    %54 = tpu.matmul %52, %27, %cst_34 {dimension_numbers = #tpu.dot_dimension_numbers<[1], [1], [0], [0], [0, 0, 1, 0], [], []>} : vector<32x128xf32>, vector<128x128xf32>, vector<32x128xf32> -> vector<32x128xf32>
    %55 = arith.addf %53, %54 : vector<32x128xf32>
    %c0_35 = arith.constant 0 : index
    %c0_36 = arith.constant 0 : index
    %56 = vector.load %arg22[%c0_35, %c0_36] : memref<32x128xf32, #tpu.memory_space<vmem>>, vector<32x128xf32>
    tpu.vector_store %arg22[%c0_35, %c0_36], %55 {strides = array<i32>} : memref<32x128xf32, #tpu.memory_space<vmem>>, vector<32x128xf32>,
    %c0_37 = arith.constant 0 : index
    %c0_38 = arith.constant 0 : index
    %57 = vector.load %arg23[%c0_37, %c0_38] : memref<32x1xf32, #tpu.memory_space<vmem>>, vector<32x1xf32>
    %cst_39 = arith.constant dense<0.000000e+00> : vector<32xf32>
    %58 = vector.multi_reduction <add>, %52, %cst_39 [1] : vector<32x128xf32> to vector<32xf32>
    %59 = vector.shape_cast %58 : vector<32xf32> to vector<32x1xf32>
    %60 = arith.addf %57, %59 : vector<32x1xf32>
    %c0_40 = arith.constant 0 : index
    %c0_41 = arith.constant 0 : index
    %61 = vector.load %arg23[%c0_40, %c0_41] : memref<32x1xf32, #tpu.memory_space<vmem>>, vector<32x1xf32>
    tpu.vector_store %arg23[%c0_40, %c0_41], %60 {strides = array<i32>} : memref<32x1xf32, #tpu.memory_space<vmem>>, vector<32x1xf32>,
    %c1_i32 = arith.constant 1 : i32
    %62 = arith.cmpi eq, %arg1, %c1_i32 : i32
    %63 = arith.extui %62 : i1 to i32
    %c0_i32_42 = arith.constant 0 : i32
    %64 = arith.cmpi ne, %63, %c0_i32_42 : i32
    scf.if %64 {
      %c0_43 = arith.constant 0 : index
      %c0_44 = arith.constant 0 : index
      %65 = vector.load %arg22[%c0_43, %c0_44] : memref<32x128xf32, #tpu.memory_space<vmem>>, vector<32x128xf32>
      %c0_45 = arith.constant 0 : index
      %c0_46 = arith.constant 0 : index
      %66 = vector.load %arg23[%c0_45, %c0_46] : memref<32x1xf32, #tpu.memory_space<vmem>>, vector<32x1xf32>
      %c0_47 = arith.constant 0 : index
      %c0_48 = arith.constant 0 : index
      %67 = vector.load %arg12[%c0_47, %c0_48] : memref<32x128xf32, #tpu.memory_space<vmem>>, vector<32x128xf32>
      %68 = vector.broadcast %66 : vector<32x1xf32> to vector<32x128xf32>
      %69 = arith.mulf %68, %67 : vector<32x128xf32>
      %70 = arith.subf %65, %69 : vector<32x128xf32>
      %c0_49 = arith.constant 0 : index
      %c0_50 = arith.constant 0 : index
      %71 = vector.load %arg13[%c0_49, %c0_50] : memref<32x1xf32, #tpu.memory_space<vmem>>, vector<32x1xf32>
      %72 = vector.broadcast %71 : vector<32x1xf32> to vector<32x128xf32>
      %73 = arith.mulf %70, %72 : vector<32x128xf32>
      %c0_51 = arith.constant 0 : index
      %c0_52 = arith.constant 0 : index
      %74 = vector.load %arg14[%c0_51, %c0_52] : memref<32x1xf32, #tpu.memory_space<vmem>>, vector<32x1xf32>
      %75 = vector.broadcast %74 : vector<32x1xf32> to vector<32x128xf32>
      %76 = arith.addf %73, %75 : vector<32x128xf32>
      %cst_53 = arith.constant 0.000000e+00 : f32
      %77 = vector.broadcast %cst_53 : f32 to vector<32x128xf32>
      %78 = arith.maximumf %76, %77 : vector<32x128xf32>
      %cst_54 = arith.constant dense<0.000000e+00> : vector<128xf32>
      %79 = vector.multi_reduction <add>, %78, %cst_54 [0] : vector<32x128xf32> to vector<128xf32>
      %80 = vector.shape_cast %79 : vector<128xf32> to vector<1x128xf32>
      %cst_55 = arith.constant 3.200000e+01 : f32
      %81 = vector.broadcast %cst_55 : f32 to vector<1x128xf32>
      %82 = arith.divf %80, %81 : vector<1x128xf32>
      %c0_56 = arith.constant 0 : index
      %c0_57 = arith.constant 0 : index
      %83 = vector.load %arg15[%c0_56, %c0_57] : memref<128x128xf32, #tpu.memory_space<vmem>>, vector<128x128xf32>
      %cst_58 = arith.constant dense<0.000000e+00> : vector<1x128xf32>
      %84 = tpu.matmul %82, %83, %cst_58 {dimension_numbers = #tpu.dot_dimension_numbers<[1], [0], [0], [1], [0, 0, 1, 1], [], []>} : vector<1x128xf32>, vector<128x128xf32>, vector<1x128xf32> -> vector<1x128xf32>
      %c0_59 = arith.constant 0 : index
      %c0_60 = arith.constant 0 : index
      %85 = vector.load %arg16[%c0_59, %c0_60] : memref<1x128xf32, #tpu.memory_space<vmem>>, vector<1x128xf32>
      %86 = arith.addf %84, %85 : vector<1x128xf32>
      %87 = arith.negf %86 : vector<1x128xf32>
      %88 = math.exp %87 : vector<1x128xf32>
      %cst_61 = arith.constant 1.000000e+00 : f32
      %89 = vector.broadcast %cst_61 : f32 to vector<1x128xf32>
      %90 = arith.addf %89, %88 : vector<1x128xf32>
      %91 = arith.divf %89, %90 : vector<1x128xf32>
      %c0_62 = arith.constant 0 : index
      %c0_63 = arith.constant 0 : index
      %c0_64 = arith.constant 0 : index
      %92 = vector.load %arg20[%c0_62, %c0_63, %c0_64] : memref<1x1x128xf32, #tpu.memory_space<vmem>>, vector<1x1x128xf32>
      %93 = vector.shape_cast %92 : vector<1x1x128xf32> to vector<1x128xf32>
      %94 = vector.shape_cast %91 : vector<1x128xf32> to vector<1x1x128xf32>
      tpu.vector_store %arg20[%c0_62, %c0_63, %c0_64], %94 {strides = array<i32>} : memref<1x1x128xf32, #tpu.memory_space<vmem>>, vector<1x1x128xf32>,
      %c0_65 = arith.constant 0 : index
      %c0_66 = arith.constant 0 : index
      %95 = vector.load %arg17[%c0_65, %c0_66] : memref<128x8xf32, #tpu.memory_space<vmem>>, vector<128x8xf32>
      %cst_67 = arith.constant dense<0.000000e+00> : vector<1x8xf32>
      %96 = tpu.matmul %82, %95, %cst_67 {dimension_numbers = #tpu.dot_dimension_numbers<[1], [0], [0], [1], [0, 0, 1, 1], [], []>} : vector<1x128xf32>, vector<128x8xf32>, vector<1x8xf32> -> vector<1x8xf32>
      %c0_68 = arith.constant 0 : index
      %c0_69 = arith.constant 0 : index
      %97 = vector.load %arg18[%c0_68, %c0_69] : memref<1x8xf32, #tpu.memory_space<vmem>>, vector<1x8xf32>
      %98 = arith.addf %96, %97 : vector<1x8xf32>
      %c0_70 = arith.constant 0 : index
      %c0_71 = arith.constant 0 : index
      %c0_72 = arith.constant 0 : index
      %99 = vector.load %arg21[%c0_70, %c0_71, %c0_72] : memref<1x1x8xf32, #tpu.memory_space<vmem>>, vector<1x1x8xf32>
      %100 = vector.shape_cast %99 : vector<1x1x8xf32> to vector<1x8xf32>
      %101 = vector.shape_cast %98 : vector<1x8xf32> to vector<1x1x8xf32>
      tpu.vector_store %arg21[%c0_70, %c0_71, %c0_72], %101 {strides = array<i32>} : memref<1x1x8xf32, #tpu.memory_space<vmem>>, vector<1x1x8xf32>,
    } else {
    }
    return
  }
  func.func @transform_0(%arg0: i32, %arg1: i32) -> (i32, i32, i32) {
    %c0_i32 = arith.constant 0 : i32
    %c0_i32_0 = arith.constant 0 : i32
    return %arg0, %c0_i32, %arg1 : i32, i32, i32
  }
  func.func @transform_1(%arg0: i32, %arg1: i32) -> (i32, i32) {
    %c0_i32 = arith.constant 0 : i32
    %c0_i32_0 = arith.constant 0 : i32
    %c0_i32_1 = arith.constant 0 : i32
    return %c0_i32, %c0_i32_0 : i32, i32
  }
  func.func @transform_2(%arg0: i32, %arg1: i32) -> (i32, i32) {
    %c0_i32 = arith.constant 0 : i32
    %c0_i32_0 = arith.constant 0 : i32
    %c0_i32_1 = arith.constant 0 : i32
    return %c0_i32, %c0_i32_0 : i32, i32
  }
  func.func @transform_3(%arg0: i32, %arg1: i32) -> (i32, i32) {
    %c0_i32 = arith.constant 0 : i32
    %c0_i32_0 = arith.constant 0 : i32
    %c0_i32_1 = arith.constant 0 : i32
    return %c0_i32, %c0_i32_0 : i32, i32
  }
  func.func @transform_4(%arg0: i32, %arg1: i32) -> (i32, i32) {
    %c0_i32 = arith.constant 0 : i32
    %c0_i32_0 = arith.constant 0 : i32
    %c0_i32_1 = arith.constant 0 : i32
    return %c0_i32, %c0_i32_0 : i32, i32
  }
  func.func @transform_5(%arg0: i32, %arg1: i32) -> (i32, i32) {
    %c0_i32 = arith.constant 0 : i32
    %c0_i32_0 = arith.constant 0 : i32
    %c0_i32_1 = arith.constant 0 : i32
    return %c0_i32, %c0_i32_0 : i32, i32
  }
  func.func @transform_6(%arg0: i32, %arg1: i32) -> (i32, i32) {
    %c0_i32 = arith.constant 0 : i32
    %c0_i32_0 = arith.constant 0 : i32
    %c0_i32_1 = arith.constant 0 : i32
    return %c0_i32, %c0_i32_0 : i32, i32
  }
  func.func @transform_7(%arg0: i32, %arg1: i32) -> (i32, i32) {
    %c0_i32 = arith.constant 0 : i32
    %c0_i32_0 = arith.constant 0 : i32
    %c0_i32_1 = arith.constant 0 : i32
    return %c0_i32, %c0_i32_0 : i32, i32
  }
  func.func @transform_8(%arg0: i32, %arg1: i32) -> (i32, i32) {
    %c0_i32 = arith.constant 0 : i32
    %c0_i32_0 = arith.constant 0 : i32
    %c0_i32_1 = arith.constant 0 : i32
    return %c0_i32, %c0_i32_0 : i32, i32
  }
  func.func @transform_9(%arg0: i32, %arg1: i32) -> (i32, i32) {
    %c0_i32 = arith.constant 0 : i32
    %c0_i32_0 = arith.constant 0 : i32
    %c0_i32_1 = arith.constant 0 : i32
    return %c0_i32, %c0_i32_0 : i32, i32
  }
  func.func @transform_10(%arg0: i32, %arg1: i32) -> (i32, i32) {
    %c0_i32 = arith.constant 0 : i32
    %c0_i32_0 = arith.constant 0 : i32
    %c0_i32_1 = arith.constant 0 : i32
    return %c0_i32, %c0_i32_0 : i32, i32
  }
  func.func @transform_11(%arg0: i32, %arg1: i32) -> (i32, i32) {
    %c0_i32 = arith.constant 0 : i32
    %c0_i32_0 = arith.constant 0 : i32
    %c0_i32_1 = arith.constant 0 : i32
    return %c0_i32, %c0_i32_0 : i32, i32
  }
  func.func @transform_12(%arg0: i32, %arg1: i32) -> (i32, i32) {
    %c0_i32 = arith.constant 0 : i32
    %c0_i32_0 = arith.constant 0 : i32
    %c0_i32_1 = arith.constant 0 : i32
    return %c0_i32, %c0_i32_0 : i32, i32
  }
  func.func @transform_13(%arg0: i32, %arg1: i32) -> (i32, i32) {
    %c0_i32 = arith.constant 0 : i32
    %c0_i32_0 = arith.constant 0 : i32
    %c0_i32_1 = arith.constant 0 : i32
    return %c0_i32, %c0_i32_0 : i32, i32
  }
  func.func @transform_14(%arg0: i32, %arg1: i32) -> (i32, i32) {
    %c0_i32 = arith.constant 0 : i32
    %c0_i32_0 = arith.constant 0 : i32
    %c0_i32_1 = arith.constant 0 : i32
    return %c0_i32, %c0_i32_0 : i32, i32
  }
  func.func @transform_15(%arg0: i32, %arg1: i32) -> (i32, i32) {
    %c0_i32 = arith.constant 0 : i32
    %c0_i32_0 = arith.constant 0 : i32
    %c0_i32_1 = arith.constant 0 : i32
    return %c0_i32, %c0_i32_0 : i32, i32
  }
  func.func @transform_16(%arg0: i32, %arg1: i32) -> (i32, i32) {
    %c0_i32 = arith.constant 0 : i32
    %c0_i32_0 = arith.constant 0 : i32
    %c0_i32_1 = arith.constant 0 : i32
    return %c0_i32, %c0_i32_0 : i32, i32
  }
  func.func @transform_17(%arg0: i32, %arg1: i32) -> (i32, i32, i32) {
    %c0_i32 = arith.constant 0 : i32
    %c0_i32_0 = arith.constant 0 : i32
    return %arg0, %c0_i32, %arg1 : i32, i32, i32
  }
  func.func @transform_18(%arg0: i32, %arg1: i32) -> (i32, i32, i32) {
    %c0_i32 = arith.constant 0 : i32
    %c0_i32_0 = arith.constant 0 : i32
    %c0_i32_1 = arith.constant 0 : i32
    return %arg0, %c0_i32, %c0_i32_0 : i32, i32, i32
  }
  func.func @transform_19(%arg0: i32, %arg1: i32) -> (i32, i32, i32) {
    %c0_i32 = arith.constant 0 : i32
    %c0_i32_0 = arith.constant 0 : i32
    %c0_i32_1 = arith.constant 0 : i32
    return %arg0, %c0_i32, %c0_i32_0 : i32, i32, i32
  }
}

module attributes {stable_mosaic.version = 11 : i64} {
  func.func @enc_head_phase_b_kernel(%arg0: i32, %arg1: i32, %arg2: memref<1x128x128xf32, #tpu.memory_space<vmem>>, %arg3: memref<1x128x1xf32, #tpu.memory_space<vmem>>, %arg4: memref<8x128xf32, #tpu.memory_space<vmem>>, %arg5: memref<8x1xf32, #tpu.memory_space<vmem>>, %arg6: memref<1x8x128xf32, #tpu.memory_space<vmem>>) attributes {dimension_semantics = [#tpu.dimension_semantics<parallel>, #tpu.dimension_semantics<parallel>], iteration_bounds = array<i64: 2, 2>, scalar_prefetch = 0 : i64, scratch_operands = 0 : i64, tpu.core_type = #tpu.core_type<tc>, window_params = [{transform_indices = @transform_0, window_bounds = array<i64: 1, 128, 128>}, {transform_indices = @transform_1, window_bounds = array<i64: 1, 128, 1>}, {pipeline_mode = #tpu.pipeline_mode<synchronous>, transform_indices = @transform_2, window_bounds = array<i64: 8, 128>}, {pipeline_mode = #tpu.pipeline_mode<synchronous>, transform_indices = @transform_3, window_bounds = array<i64: 8, 1>}, {transform_indices = @transform_4, window_bounds = array<i64: 1, 8, 128>}]} {
    %c0 = arith.constant 0 : index
    %c0_0 = arith.constant 0 : index
    %c0_1 = arith.constant 0 : index
    %0 = vector.load %arg2[%c0, %c0_0, %c0_1] : memref<1x128x128xf32, #tpu.memory_space<vmem>>, vector<1x128x128xf32>
    %1 = vector.shape_cast %0 : vector<1x128x128xf32> to vector<128x128xf32>
    %c0_2 = arith.constant 0 : index
    %c0_3 = arith.constant 0 : index
    %c0_4 = arith.constant 0 : index
    %2 = vector.load %arg3[%c0_2, %c0_3, %c0_4] : memref<1x128x1xf32, #tpu.memory_space<vmem>>, vector<1x128x1xf32>
    %3 = vector.shape_cast %2 : vector<1x128x1xf32> to vector<128x1xf32>
    %cst = arith.constant 1.000000e+00 : f32
    %4 = vector.broadcast %cst : f32 to vector<128x1xf32>
    %5 = arith.addf %4, %3 : vector<128x1xf32>
    %6 = vector.broadcast %5 : vector<128x1xf32> to vector<128x128xf32>
    %7 = arith.mulf %1, %6 : vector<128x128xf32>
    %c0_5 = arith.constant 0 : index
    %c0_6 = arith.constant 0 : index
    %8 = vector.load %arg4[%c0_5, %c0_6] : memref<8x128xf32, #tpu.memory_space<vmem>>, vector<8x128xf32>
    %cst_7 = arith.constant dense<0.000000e+00> : vector<8x128xf32>
    %9 = tpu.matmul %8, %7, %cst_7 {dimension_numbers = #tpu.dot_dimension_numbers<[1], [0], [0], [1], [0, 0, 1, 1], [], []>} : vector<8x128xf32>, vector<128x128xf32>, vector<8x128xf32> -> vector<8x128xf32>
    %c0_8 = arith.constant 0 : index
    %c0_9 = arith.constant 0 : index
    %10 = vector.load %arg5[%c0_8, %c0_9] : memref<8x1xf32, #tpu.memory_space<vmem>>, vector<8x1xf32>
    %11 = vector.broadcast %10 : vector<8x1xf32> to vector<8x128xf32>
    %12 = arith.addf %9, %11 : vector<8x128xf32>
    %c0_10 = arith.constant 0 : index
    %c0_11 = arith.constant 0 : index
    %c0_12 = arith.constant 0 : index
    %13 = vector.load %arg6[%c0_10, %c0_11, %c0_12] : memref<1x8x128xf32, #tpu.memory_space<vmem>>, vector<1x8x128xf32>
    %14 = vector.shape_cast %13 : vector<1x8x128xf32> to vector<8x128xf32>
    %15 = vector.shape_cast %12 : vector<8x128xf32> to vector<1x8x128xf32>
    tpu.vector_store %arg6[%c0_10, %c0_11, %c0_12], %15 {strides = array<i32>} : memref<1x8x128xf32, #tpu.memory_space<vmem>>, vector<1x8x128xf32>,
    return
  }
  func.func @transform_0(%arg0: i32, %arg1: i32) -> (i32, i32, i32) {
    %c0_i32 = arith.constant 0 : i32
    %c0_i32_0 = arith.constant 0 : i32
    return %arg0, %c0_i32, %arg1 : i32, i32, i32
  }
  func.func @transform_1(%arg0: i32, %arg1: i32) -> (i32, i32, i32) {
    %c0_i32 = arith.constant 0 : i32
    %c0_i32_0 = arith.constant 0 : i32
    %c0_i32_1 = arith.constant 0 : i32
    return %arg0, %c0_i32, %c0_i32_0 : i32, i32, i32
  }
  func.func @transform_2(%arg0: i32, %arg1: i32) -> (i32, i32) {
    %c0_i32 = arith.constant 0 : i32
    %c0_i32_0 = arith.constant 0 : i32
    %c0_i32_1 = arith.constant 0 : i32
    return %c0_i32, %c0_i32_0 : i32, i32
  }
  func.func @transform_3(%arg0: i32, %arg1: i32) -> (i32, i32) {
    %c0_i32 = arith.constant 0 : i32
    %c0_i32_0 = arith.constant 0 : i32
    %c0_i32_1 = arith.constant 0 : i32
    return %c0_i32, %c0_i32_0 : i32, i32
  }
  func.func @transform_4(%arg0: i32, %arg1: i32) -> (i32, i32, i32) {
    %c0_i32 = arith.constant 0 : i32
    %c0_i32_0 = arith.constant 0 : i32
    return %arg0, %c0_i32, %arg1 : i32, i32, i32
  }
}

</mosaic_0001>

<bundles_post_ra>
// kernel: enc_head_forward.3
= control target key start
LH: loop header
LB: loop body
LE: loop exit
PB: predicated region body
PF: predicated region fallthrough
CT: control target
= control target key end

     0   :  { %s897_s15 = smov 0   ;;  %s899_s16 = smov 0   ;;  %s1063_s0 = inlined_call_operand.vmem [shape: f32[2,128,256], index: 0, kind: input, shape index: {}]   ;;  %s1064_s1 = inlined_call_operand.vmem [shape: f32[2,128,1], index: 1, kind: input, shape index: {}]   ;;  %s1065_s2 = inlined_call_operand.vmem [shape: f32[8,128], index: 2, kind: input, shape index: {}]   ;;  %s1066_s3 = inlined_call_operand.vmem [shape: f32[8,1], index: 3, kind: input, shape index: {}]   ;;  %s1067_s4 = inlined_call_operand.vmem [shape: f32[2,8,256], index: 4, kind: output, shape index: {}]  }
   0x1   :  { %s901_s17 = smov 0   ;;  %s903_s18 = smov 0  }
   0x2   :  { %s905_s19 = smov 0   ;;  %s907_s20 = smov 0  }
   0x3   :  { %s909_s21 = smov 0  }
   0x4 LB: > { %s23_s22 = sadd.s32 1, %s858_s19  ;;  %s26_s23 = sadd.s32 1, %s862_s20  ;;  %s866_s21 = sphi %s909_s21, %s14_s21   ;;  %s862_s20 = sphi %s907_s20, %s1073_s20   ;;  %s858_s19 = sphi %s905_s19, %s1072_s19   ;;  %s854_s18 = sphi %s903_s18, %s1071_s18   ;;  %s850_s17 = sphi %s901_s17, %s1070_s17   ;;  %s846_s16 = sphi %s899_s16, %s1069_s16   ;;  %s842_s15 = sphi %s897_s15, %s1068_s15  }
   0x5   : > { %p24_p0 = scmp.ge.s32.totalorder %s23_s22, 2  ;;  %p42_p1 = scmp.ne.s32.totalorder %s846_s16, %s842_s15 }
   0x6   : > { %p43_p2 = scmp.eq.s32.totalorder %s866_s21, 0  ;;  %s35_s27 = sadd.s32 1, %s846_s16 }
   0x7   : > { %s1075_s22 = smov (%p24_p0, %s23_s22), 0  ;;  %s1077_s23 = smov (!%p24_p0, %s26_s23), %s862_s20 }
   0x8   : > { %p44_p3 = por %p43_p2, %p42_p1  ;;  %p28_p4 = scmp.ge.s32.totalorder %s1077_s23, 2 }
   0x9   : > { %s31_s24 = ssub.s32 %s858_s19, %s1075_s22  ;;  %p661_p6 = scmp.ge.s32.totalorder %s866_s21, 4 }
   0xa   : > { %s1079_s23 = smov (%p28_p4, %s1077_s23), 0 }
   0xb   : > { %s30_s25 = ssub.s32 %s862_s20, %s1079_s23  ;;  %170 = sbr.rel (%p661_p6) target bundleno = 32 (0x20), region = 24 }
   0xc   : > { %s32_s26 = sor.u32 %s31_s24, %s30_s25 }
   0xd   : > { %p33_p5 = scmp.eq.s32.totalorder %s32_s26, 0 }
   0xf   : > { %s948_s28 = scalar_select %p33_p5, %s846_s16, %s35_s27  }
  0x12   : > { %173 = sbr.rel (!%p44_p3) target bundleno = 32 (0x20), region = 28  ;;  %s175_s29 = sand.u32 (%p44_p3), 1, %s846_s16  }
  0x13   : > { %s663_s30 = sshll.u32 (%p44_p3), %s862_s20, 5  ;;  %s662_s5 = sshll.u32 (%p44_p3), %s175_s29, 7 }
  0x14   : > { %s179_s6 = sadd.s32 (%p44_p3), %s858_s19, %s663_s30  ;;  %s177_s11 = scalar_lea.vmem (%p44_p3), [#allocation2], %s662_s5 }
  0x15   : > { %s664_s7 = sshll.u32 (%p44_p3), %s179_s6, 3 }
  0x16   : > { %s957_s10 = scalar_lea.vmem (%p44_p3), %s1063_s0, %s664_s7 }
  0x17   : > { %v239_v0 = vld [vmem:[%s957_s10] sm:$0xff] (%p44_p3)  ;;  %v241_v1 = vld [vmem:[%s957_s10 + $0x10] sm:$0xff] (%p44_p3) }
  0x18   : > { %v243_v2 = vld [vmem:[%s957_s10 + $0x20] sm:$0xff] (%p44_p3)  ;;  %240 = vst [vmem:[%s177_s11] sm:$0xff] (%p44_p3), %v239_v0  ;;  %242 = vst [vmem:[%s177_s11 + $0x8] sm:$0xff] (%p44_p3), %v241_v1  ;;  %v245_v3 = vld [vmem:[%s957_s10 + $0x30] sm:$0xff] (%p44_p3) }
  0x19   : > { %244 = vst [vmem:[%s177_s11 + $0x10] sm:$0xff] %v243_v2  ;;  %v247_v4 = vld [vmem:[%s957_s10 + $0x40] sm:$0xff]  ;;  %v249_v5 = vld [vmem:[%s957_s10 + $0x50] sm:$0xff]  ;;  %246 = vst [vmem:[%s177_s11 + $0x18] sm:$0xff] %v245_v3 }
  0x1a   : > { %248 = vst [vmem:[%s177_s11 + $0x20] sm:$0xff] %v247_v4  ;;  %250 = vst [vmem:[%s177_s11 + $0x28] sm:$0xff] %v249_v5  ;;  %v251_v6 = vld [vmem:[%s957_s10 + $0x60] sm:$0xff]  ;;  %v253_v7 = vld [vmem:[%s957_s10 + $0x70] sm:$0xff] }
  0x1b   : > { %v255_v8 = vld [vmem:[%s957_s10 + $0x80] sm:$0xff]  ;;  %252 = vst [vmem:[%s177_s11 + $0x30] sm:$0xff] %v251_v6  ;;  %254 = vst [vmem:[%s177_s11 + $0x38] sm:$0xff] %v253_v7  ;;  %v257_v9 = vld [vmem:[%s957_s10 + $0x90] sm:$0xff] }
  0x1c   : > { %256 = vst [vmem:[%s177_s11 + $0x40] sm:$0xff] %v255_v8  ;;  %v259_v10 = vld [vmem:[%s957_s10 + $0xa0] sm:$0xff]  ;;  %v261_v11 = vld [vmem:[%s957_s10 + $0xb0] sm:$0xff]  ;;  %258 = vst [vmem:[%s177_s11 + $0x48] sm:$0xff] %v257_v9 }
  0x1d   : > { %260 = vst [vmem:[%s177_s11 + $0x50] sm:$0xff] %v259_v10  ;;  %262 = vst [vmem:[%s177_s11 + $0x58] sm:$0xff] %v261_v11  ;;  %v263_v12 = vld [vmem:[%s957_s10 + $0xc0] sm:$0xff]  ;;  %v265_v13 = vld [vmem:[%s957_s10 + $0xd0] sm:$0xff] }
  0x1e   : > { %v267_v14 = vld [vmem:[%s957_s10 + $0xe0] sm:$0xff]  ;;  %264 = vst [vmem:[%s177_s11 + $0x60] sm:$0xff] %v263_v12  ;;  %266 = vst [vmem:[%s177_s11 + $0x68] sm:$0xff] %v265_v13  ;;  %v269_v15 = vld [vmem:[%s957_s10 + $0xf0] sm:$0xff] }
  0x1f   : > { %268 = vst [vmem:[%s177_s11 + $0x70] sm:$0xff] %v267_v14  ;;  %270 = vst [vmem:[%s177_s11 + $0x78] sm:$0xff] %v269_v15 }
  0x20 PF: > { %p665_p7 = scmp.ge.s32.totalorder %s866_s21, 1  ;;  %p283_p8 = scmp.lt.s32.totalorder %s866_s21, 5 }
  0x22   : > { %p284_p9 = pnand %p665_p7, %p283_p8 }
  0x23   : > { %p323_p10 = scmp.lt.s32.totalorder (!%p284_p9), %s854_s18, 1  ;;  %v868_v16 = vmov (!%p284_p9), 0   ;;  %v869_v31 = vmov (!%p284_p9), 0.0|0.0   ;;  %v481_v50 = vld [vmem:[%s1066_s3] sm:$0xff] (!%p284_p9)  ;;  %vm870_vm0 = vmmov (!%p284_p9), 0   ;;  %v871_v51 = vmov (!%p284_p9), 0.0  }
  0x24   : > { %287 = sbr.rel (%p284_p9) target bundleno = 431 (0x1af), region = 70  ;;  %811 = vset.pattern.permute.xlu1 (!%p284_p9), %v868_v16  ;;  %810 = vset.pattern.permute.xlu0 (!%p284_p9), %v868_v16  ;;  %s290_s27 = sand.u32 (!%p284_p9), 1, %s842_s15  }
  0x25   : > { %726 = vmatprep.subr.bf16.mxu0 (!%p284_p9), %v869_v31  ;;  %723 = vmatprep.mubr.msk.f32.mxu0 (!%p284_p9), %vm870_vm0, %v871_v51  ;;  %s666_s29 = sshll.u32 (!%p284_p9), %s290_s27, 7  ;;  %p330_p11 = scmp.lt.s32.totalorder (!%p284_p9), %s850_s17, 1 }
  0x26   : > { %s1008_s30 = scalar_lea.vmem (!%p284_p9), [#allocation2], %s666_s29 }
  0x27   : > { %v336_v54 = vld [vmem:[%s1008_s30] sm:$0xff] (!%p284_p9)  ;;  %v337_v55 = vld [vmem:[%s1008_s30 + $0x8] sm:$0xff] (!%p284_p9)  ;;  %v338_v56 = vld [vmem:[%s1008_s30 + $0x10] sm:$0xff] (!%p284_p9) }
  0x28   : > { %v339_v58 = vld [vmem:[%s1008_s30 + $0x18] sm:$0xff] (!%p284_p9)  ;;  %v341_v2 = vld [vmem:[%s1008_s30 + $0x28] sm:$0xff] (!%p284_p9)  ;;  %v340_v4 = vld [vmem:[%s1008_s30 + $0x20] sm:$0xff] (!%p284_p9) }
  0x29   : > { %v343_v9 = vld [vmem:[%s1008_s30 + $0x38] sm:$0xff] (!%p284_p9)  ;;  %v342_v11 = vld [vmem:[%s1008_s30 + $0x30] sm:$0xff] (!%p284_p9)  ;;  %v345_v16 = vld [vmem:[%s1008_s30 + $0x48] sm:$0xff] (!%p284_p9) }
  0x2b   : > { %s1081_s18 = smov (!%p323_p10, %s854_s18), 1  ;;  %s1083_s17 = smov (!%p330_p11, %s850_s17), 1 }
  0x2c   : > { %s673_s12 = sshll.u32 %s1081_s18, 7  ;;  %s669_s6 = sshll.u32 %s1081_s18, 1 }
  0x2d   : > { %s985_s24 = scalar_lea.vmem %s1064_s1, %s673_s12  ;;  %s333_s7 = sadd.s32 %s669_s6, %s1083_s17 }
  0x2e   : > { %v354_v17 = vld [vmem:[%s985_s24 + $0x10] sm:$0xff]  ;;  %v352_v18 = vld [vmem:[%s985_s24] sm:$0xff]  ;;  %v355_v19 = vld [vmem:[%s985_s24 + $0x18] sm:$0xff]  ;;  %s670_s8 = sshll.u32 %s333_s7, 3 }
  0x2f   : > { %v370_v20 = vadd.f32 1.0, %v354_v17  ;;  %v368_v21 = vadd.f32 1.0, %v352_v18  ;;  %v353_v22 = vld [vmem:[%s985_s24 + $0x8] sm:$0xff]  ;;  %v371_v23 = vadd.f32 1.0, %v355_v19  ;;  %v356_v26 = vld [vmem:[%s985_s24 + $0x20] sm:$0xff]  ;;  %v359_v29 = vld [vmem:[%s985_s24 + $0x38] sm:$0xff]  ;;  %s335_s11 = scalar_lea.vmem %s1067_s4, %s670_s8 }
  0x30   : > { %v369_v24 = vadd.f32 1.0, %v353_v22  ;;  %v357_v25 = vld [vmem:[%s985_s24 + $0x28] sm:$0xff]  ;;  %v372_v28 = vadd.f32 1.0, %v356_v26  ;;  %v358_v30 = vld [vmem:[%s985_s24 + $0x30] sm:$0xff]  ;;  %v375_v32 = vadd.f32 1.0, %v359_v29  ;;  %v360_v35 = vld [vmem:[%s985_s24 + $0x40] sm:$0xff] }
  0x31   : > { %396 = vperm.xlu1 %811, %v370_v20   ;;  %386 = vperm.xlu0 %810, %v368_v21   ;;  %v373_v27 = vadd.f32 1.0, %v357_v25  ;;  %v374_v33 = vadd.f32 1.0, %v358_v30  ;;  %v361_v34 = vld [vmem:[%s985_s24 + $0x48] sm:$0xff]  ;;  %v376_v37 = vadd.f32 1.0, %v360_v35  ;;  %v363_v38 = vld [vmem:[%s985_s24 + $0x58] sm:$0xff]  ;;  %v362_v39 = vld [vmem:[%s985_s24 + $0x50] sm:$0xff] }
  0x32   : > { %v377_v36 = vadd.f32 1.0, %v361_v34  ;;  %v379_v40 = vadd.f32 1.0, %v363_v38  ;;  %v378_v41 = vadd.f32 1.0, %v362_v39  ;;  %v365_v42 = vld [vmem:[%s985_s24 + $0x68] sm:$0xff]  ;;  %v364_v43 = vld [vmem:[%s985_s24 + $0x60] sm:$0xff]  ;;  %v367_v46 = vld [vmem:[%s985_s24 + $0x78] sm:$0xff] }
  0x33   : > { %v381_v44 = vadd.f32 1.0, %v365_v42  ;;  %v380_v45 = vadd.f32 1.0, %v364_v43  ;;  %v366_v47 = vld [vmem:[%s985_s24 + $0x70] sm:$0xff]  ;;  %v383_v48 = vadd.f32 1.0, %v367_v46  ;;  %v344_v18 = vld [vmem:[%s1008_s30 + $0x40] sm:$0xff]  ;;  %v349_v30 = vld [vmem:[%s1008_s30 + $0x68] sm:$0xff] }
  0x34   : > { %v382_v49 = vadd.f32 1.0, %v366_v47  ;;  %v346_v25 = vld [vmem:[%s1008_s30 + $0x50] sm:$0xff]  ;;  %v351_v38 = vld [vmem:[%s1008_s30 + $0x78] sm:$0xff] }
  0x35   : > { %401 = vperm.xlu1 %811, %v371_v23   ;;  %391 = vperm.xlu0 %810, %v369_v24   ;;  %v347_v23 = vld [vmem:[%s1008_s30 + $0x58] sm:$0xff] }
  0x39   : > { %411 = vperm.xlu1 %811, %v373_v27   ;;  %406 = vperm.xlu0 %810, %v372_v28  }
  0x3d   : > { %421 = vperm.xlu1 %811, %v375_v32   ;;  %416 = vperm.xlu0 %810, %v374_v33   ;;  %v348_v33 = vld [vmem:[%s1008_s30 + $0x60] sm:$0xff] }
  0x41   : > { %431 = vperm.xlu1 %811, %v377_v36   ;;  %426 = vperm.xlu0 %810, %v376_v37  }
  0x45   : > { %441 = vperm.xlu1 %811, %v379_v40   ;;  %436 = vperm.xlu0 %810, %v378_v41   ;;  %v350_v40 = vld [vmem:[%s1008_s30 + $0x70] sm:$0xff] }
  0x49   : > { %451 = vperm.xlu1 %811, %v381_v44   ;;  %446 = vperm.xlu0 %810, %v380_v45   ;;  %v480_v45 = vld [vmem:[%s1065_s2] sm:$0xff] }
  0x4d   : > { %461 = vperm.xlu1 %811, %v383_v48   ;;  %456 = vperm.xlu0 %810, %v382_v49  }
  0x51   : > { %484 = vperm.xlu0 %810, %v481_v50  }
  0xb0   : > { %v397_v52 = vpop.permute.xlu1 %396  ;;  %v387_v53 = vpop.permute.xlu0 %386 }
  0xb1   : > { %v464_v60 = vmul.f32 %v387_v53, %v336_v54  ;;  %v466_v62 = vmul.f32 %v397_v52, %v338_v56 }
  0xb4   : > { %v402_v57 = vpop.permute.xlu1 %401  ;;  %v392_v59 = vpop.permute.xlu0 %391 }
  0xb5   : > { %v465_v61 = vmul.f32 %v392_v59, %v337_v55  ;;  %v467_v63 = vmul.f32 %v402_v57, %v339_v58 }
  0xb7   : > { %v727_v0 = vpack.c.bf16 %v465_v61, %v464_v60  ;;  %v730_v5 = vpack.c.bf16 %v467_v63, %v466_v62 }
  0xb8   : > { %v412_v1 = vpop.permute.xlu1 %411  ;;  %v407_v3 = vpop.permute.xlu0 %406 }
  0xb9   : > { %728 = vmatpush3.bf16.msra.mxu0 %v727_v0  ;;  %v469_v6 = vmul.f32 %v412_v1, %v341_v2  ;;  %v468_v7 = vmul.f32 %v407_v3, %v340_v4 }
  0xba   : > { %729 = vmatprep.subr.bf16.mxu0 %v869_v31 }
  0xbb   : > { %v733_v12 = vpack.c.bf16 %v469_v6, %v468_v7 }
  0xbc   : > { %v422_v8 = vpop.permute.xlu1 %421  ;;  %v417_v10 = vpop.permute.xlu0 %416 }
  0xbd   : > { %731 = vmatpush3.bf16.msra.mxu0 %v730_v5  ;;  %v471_v13 = vmul.f32 %v422_v8, %v343_v9  ;;  %v470_v14 = vmul.f32 %v417_v10, %v342_v11 }
  0xbe   : > { %732 = vmatprep.subr.bf16.mxu0 %v869_v31 }
  0xbf   : > { %v736_v19 = vpack.c.bf16 %v471_v13, %v470_v14 }
  0xc0   : > { %v432_v15 = vpop.permute.xlu1 %431  ;;  %v427_v17 = vpop.permute.xlu0 %426 }
  0xc1   : > { %734 = vmatpush3.bf16.msra.mxu0 %v733_v12  ;;  %v473_v20 = vmul.f32 %v432_v15, %v345_v16  ;;  %v472_v21 = vmul.f32 %v427_v17, %v344_v18 }
  0xc2   : > { %735 = vmatprep.subr.bf16.mxu0 %v869_v31 }
  0xc3   : > { %v739_v26 = vpack.c.bf16 %v473_v20, %v472_v21 }
  0xc4   : > { %v442_v22 = vpop.permute.xlu1 %441  ;;  %v437_v24 = vpop.permute.xlu0 %436 }
  0xc5   : > { %737 = vmatpush3.bf16.msra.mxu0 %v736_v19  ;;  %v475_v27 = vmul.f32 %v442_v22, %v347_v23  ;;  %v474_v28 = vmul.f32 %v437_v24, %v346_v25 }
  0xc6   : > { %738 = vmatprep.subr.bf16.mxu0 %v869_v31 }
  0xc7   : > { %v742_v34 = vpack.c.bf16 %v475_v27, %v474_v28 }
  0xc8   : > { %v452_v29 = vpop.permute.xlu1 %451  ;;  %v447_v32 = vpop.permute.xlu0 %446 }
  0xc9   : > { %740 = vmatpush3.bf16.msra.mxu0 %v739_v26  ;;  %v477_v35 = vmul.f32 %v452_v29, %v349_v30  ;;  %v476_v36 = vmul.f32 %v447_v32, %v348_v33 }
  0xca   : > { %741 = vmatprep.subr.bf16.mxu0 %v869_v31 }
  0xcb   : > { %v745_v41 = vpack.c.bf16 %v477_v35, %v476_v36 }
  0xcc   : > { %v462_v37 = vpop.permute.xlu1 %461  ;;  %v457_v39 = vpop.permute.xlu0 %456 }
  0xcd   : > { %743 = vmatpush3.bf16.msra.mxu0 %v742_v34  ;;  %v479_v42 = vmul.f32 %v462_v37, %v351_v38  ;;  %v478_v43 = vmul.f32 %v457_v39, %v350_v40 }
  0xce   : > { %744 = vmatprep.subr.bf16.mxu0 %v869_v31 }
  0xcf   : > { %v748_v44 = vpack.c.bf16 %v479_v42, %v478_v43 }
  0xd0   : > { %v485_v46 = vpop.permute.xlu0 %484 }
  0xd1   : > { %746 = vmatpush3.bf16.msra.mxu0 %v745_v41 }
  0xd2   : > { %747 = vmatprep.subr.bf16.mxu0 %v869_v31 }
  0xd5   : > { %749 = vmatpush3.bf16.msra.mxu0 %v748_v44 }
  0xd8   : > { %724 = vmatmul.mubr.f32.vlgmr.msra.gmra.mrb[0].mxu0 %v480_v45 }
 0x1ab   : > { %v553_v47 = vpop.f32.mrb[0].mxu0 }
 0x1ac   : > { %v554_v48 = vadd.f32 %v553_v47, %v485_v46  ;;  %v725_v31 = vpop.f32.mrb[1].mxu0 }
 0x1ae   : > { %557 = vst [vmem:[%s335_s11] sm:$0xff] %v554_v48 }
 0x1af PF: > { %s14_s21 = sadd.s32 1, %s866_s21   ;;  %s1068_s15 = smov %s846_s16 }
 0x1b0   : > { %p11_p12 = scmp.ge.s32.totalorder %s14_s21, 6   ;;  %s1069_s16 = smov %s948_s28 }
 0x1b1   : > { %s1070_s17 = smov %s858_s19  ;;  %s1071_s18 = smov %s862_s20 }
 0x1b2   : > { %s1072_s19 = smov %s1075_s22  ;;  %s1073_s20 = smov %s1079_s23 }
 0x1b3   :  { %13 = sbr.rel (!%p11_p12) target bundleno = 4 (0x4), region = 112 }

// kernel: enc_head_forward.2
= control target key start
LH: loop header
LB: loop body
LE: loop exit
PB: predicated region body
PF: predicated region fallthrough
CT: control target
= control target key end

     0   :  { %s4124_s0 = inlined_call_operand.vmem [shape: f32[2,64,256], index: 0, kind: input, shape index: {}]   ;;  %s4125_s1 = inlined_call_operand.vmem [shape: f32[128,64], index: 1, kind: input, shape index: {}]   ;;  %s4126_s2 = inlined_call_operand.vmem [shape: f32[128,1], index: 2, kind: input, shape index: {}]   ;;  %s4127_s3 = inlined_call_operand.vmem [shape: f32[128,1], index: 3, kind: input, shape index: {}]   ;;  %s4128_s4 = inlined_call_operand.vmem [shape: f32[128,128], index: 4, kind: input, shape index: {}]   ;;  %s4129_s5 = inlined_call_operand.vmem [shape: f32[128,1], index: 5, kind: input, shape index: {}]   ;;  %s4130_s6 = inlined_call_operand.vmem [shape: f32[128,1], index: 6, kind: input, shape index: {}]   ;;  %s4131_s7 = inlined_call_operand.vmem [shape: f32[32,128], index: 7, kind: input, shape index: {}]   ;;  %s4132_s8 = inlined_call_operand.vmem [shape: f32[32,1], index: 8, kind: input, shape index: {}]   ;;  %s4133_s9 = inlined_call_operand.vmem [shape: f32[32,1], index: 9, kind: input, shape index: {}]   ;;  %s4134_s10 = inlined_call_operand.vmem [shape: f32[32,128], index: 10, kind: input, shape index: {}]   ;;  %s4135_s11 = inlined_call_operand.vmem [shape: f32[32,1], index: 11, kind: input, shape index: {}]   ;;  %s4136_s12 = inlined_call_operand.vmem [shape: f32[32,1], index: 12, kind: input, shape index: {}]   ;;  %s4137_s13 = inlined_call_operand.vmem [shape: f32[128,128], index: 13, kind: input, shape index: {}]   ;;  %s4138_s14 = inlined_call_operand.vmem [shape: f32[1,128], index: 14, kind: input, shape index: {}]   ;;  %s4139_s15 = inlined_call_operand.vmem [shape: f32[128,8], index: 15, kind: input, shape index: {}]   ;;  %s4140_s16 = inlined_call_operand.vmem [shape: f32[1,8], index: 16, kind: input, shape index: {}]   ;;  %s4141_s17 = inlined_call_operand.vmem [shape: f32[2,128,256], index: 17, kind: output, shape index: {0}]   ;;  %s4142_s18 = inlined_call_operand.vmem [shape: f32[2,1,128], index: 18, kind: output, shape index: {1}]   ;;  %s4143_s19 = inlined_call_operand.hbm [shape: f32[2,1,8], index: 19, kind: output, shape index: {2}]  }
   0x1   :  { %4160 = sst [smem:[#allocation18_spill]] %s4124_s0 }
   0x2   :  { %4161 = sst [smem:[#allocation19_spill]] %s4125_s1 }
   0x3   :  { %4162 = sst [smem:[#allocation20_spill]] %s4126_s2 }
   0x4   :  { %4163 = sst [smem:[#allocation21_spill]] %s4127_s3 }
   0x5   :  { %4164 = sst [smem:[#allocation22_spill]] %s4128_s4 }
   0x6   :  { %4165 = sst [smem:[#allocation23_spill]] %s4129_s5 }
   0x7   :  { %4166 = sst [smem:[#allocation24_spill]] %s4130_s6 }
   0x8   :  { %4167 = sst [smem:[#allocation25_spill]] %s4134_s10 }
   0x9   :  { %4168 = sst [smem:[#allocation26_spill]] %s4136_s12 }
   0xa   :  { %4169 = sst [smem:[#allocation27_spill]] %s4137_s13 }
   0xb   :  { %4170 = sst [smem:[#allocation28_spill]] %s4138_s14 }
   0xc   :  { %4171 = sst [smem:[#allocation29_spill]] %s4139_s15 }
   0xd   :  { %4172 = sst [smem:[#allocation30_spill]] %s4140_s16 }
   0xe   :  { %4173 = sst [smem:[#allocation31_spill]] %s4141_s17 }
   0xf   :  { %4174 = sst [smem:[#allocation32_spill]] %s4143_s19 }
  0x10   :  { %25 = vsyncpa [#allocation7], 0 }
  0x11   :  { %27 = vsyncpa [#allocation7 + $0x1], 0  ;;  %s3366_s0 = smov 0   ;;  %s3368_s30 = smov 0  }
  0x12   :  { %s3370_s20 = smov 0   ;;  %s3372_s21 = smov 0  }
  0x13   :  { %s3374_s1 = smov 0   ;;  %s3376_s22 = smov 0  }
  0x14   :  { %s3378_s2 = smov 0   ;;  %s3380_s23 = smov 0  }
  0x15   :  { %s3382_s24 = smov 0   ;;  %s3384_s25 = smov 0  }
  0x16 LB: > { %4175 = sst [smem:[#allocation9_spill]] %s3229_s20  ;;  %s2469_s3 = sadd.s32 4294967295, %s3257_s25   ;;  %s3257_s25 = sphi %s3384_s25, %s33_s25   ;;  %s3253_s24 = sphi %s3382_s24, %s4214_s24   ;;  %s3249_s23 = sphi %s3380_s23, %s4213_s23   ;;  %s3245_s2 = sphi %s3378_s2, %s4212_s2   ;;  %s3241_s22 = sphi %s3376_s22, %s4211_s22   ;;  %s3237_s1 = sphi %s3374_s1, %s4210_s1   ;;  %s3233_s21 = sphi %s3372_s21, %s4209_s21   ;;  %s3229_s20 = sphi %s3370_s20, %s4208_s20   ;;  %s3225_s30 = sphi %s3368_s30, %s4216_s30   ;;  %s3221_s0 = sphi %s3366_s0, %s4215_s0  }
  0x17   : > { %4176 = sst [smem:[#allocation10_spill]] %s3237_s1  ;;  %s2470_s26 = sadd.s32 4294967294, %s3257_s25  }
  0x18   : > { %4177 = sst [smem:[#allocation11_spill]] %s3249_s23  ;;  %s42_s27 = sadd.s32 1, %s3249_s23 }
  0x19   : > { %4178 = sst [smem:[#allocation12_spill]] %s3253_s24  ;;  %s45_s28 = sadd.s32 1, %s3253_s24 }
  0x1a   : > { %p43_p0 = scmp.ge.s32.totalorder %s42_s27, 2  ;;  %s54_s29 = sadd.s32 1, %s3237_s1 }
  0x1b   : > { %p61_p1 = scmp.ne.s32.totalorder %s3237_s1, %s3233_s21  ;;  %p62_p2 = scmp.eq.s32.totalorder %s3257_s25, 0 }
  0x1c   : > { %s4218_s27 = smov (%p43_p0, %s42_s27), 0  ;;  %s4220_s28 = smov (!%p43_p0, %s45_s28), %s3253_s24 }
  0x1d   : > { %4179 = sst [smem:[#allocation13_spill]] %s4218_s27  ;;  %s50_s19 = ssub.s32 %s3249_s23, %s4218_s27 }
  0x1e   : > { %p3429_p3 = por %p62_p2, %p61_p1  ;;  %p47_p4 = scmp.ge.s32.totalorder %s4220_s28, 2 }
  0x1f   : > { %p429_p5 = scmp.eq.s32.totalorder %s2469_s3, 3  ;;  %s470_s16 = sadd.s32 1, %s3229_s20 }
  0x20   : > { %p480_p6 = scmp.ne.s32.totalorder %s3229_s20, %s3225_s30  ;;  %s4222_s28 = smov (%p47_p4, %s4220_s28), 0 }
  0x21   : > { %4181 = sst [smem:[#allocation14_spill]] %s4222_s28  ;;  %p3438_p7 = por %p429_p5, %p61_p1 }
  0x22   : > { %p3442_p8 = por %p480_p6, %p429_p5  ;;  %s49_s27 = ssub.s32 %s3253_s24, %s4222_s28 }
  0x23   : > { %p486_p9 = scmp.ne.s32.totalorder %s3225_s30, %s3221_s0  ;;  %s51_s12 = sor.u32 %s50_s19, %s49_s27 }
  0x24   : > { %p468_p10 = scmp.eq.s32.totalorder %s49_s27, 0  ;;  %p52_p11 = scmp.eq.s32.totalorder %s51_s12, 0 }
  0x25   : > { %p487_p12 = scmp.eq.s32.totalorder %s2470_s26, 3  ;;  %p2472_p0 = scmp.ge.s32.totalorder %s3257_s25, 4 }
  0x26   : > { %s3451_s3 = scalar_select %p468_p10, %s3229_s20, %s470_s16  }
  0x27   : > { %s3454_s15 = scalar_select %p52_p11, %s3237_s1, %s54_s29  }
  0x28   : > { %4184 = sst [smem:[#allocation15_spill]] %s3451_s3  ;;  %p3456_p13 = por %p487_p12, %p486_p9 }
  0x29   : > { %4185 = sst [smem:[#allocation16_spill]] %s3454_s15  ;;  %551 = sbr.rel (%p2472_p0) target bundleno = 62 (0x3e), region = 80 }
  0x2a   : > { %s4186_s13 = scalar_select %p3456_p13, 1, 0 }
  0x2c   : > { %4187 = sst [smem:[#allocation17_spill]] %s4186_s13 }
  0x30   : > { %554 = sbr.rel (!%p3429_p3) target bundleno = 62 (0x3e), region = 84  ;;  %s556_s19 = sand.u32 (%p3429_p3), 1, %s3237_s1  }
  0x31   : > { %s2474_s12 = sshll.u32 (%p3429_p3), %s3253_s24, 4  ;;  %s2473_s26 = sshll.u32 (%p3429_p3), %s556_s19, 6 }
  0x32   : > { %s560_s16 = sadd.s32 (%p3429_p3), %s3249_s23, %s2474_s12  ;;  %s4188_s15 = sld [smem:[#allocation18_spill]] (%p3429_p3) }
  0x33   : > { %s2475_s27 = sshll.u32 (%p3429_p3), %s560_s16, 3  ;;  %s558_s20 = scalar_lea.vmem (%p3429_p3), [#allocation4], %s2473_s26 }
  0x38   : > { %s562_s3 = scalar_lea.vmem %s4188_s15, %s2475_s27 }
  0x39   : > { %v604_v0 = vld [vmem:[%s562_s3] sm:$0xff]  ;;  %v606_v1 = vld [vmem:[%s562_s3 + $0x10] sm:$0xff] }
  0x3a   : > { %v608_v2 = vld [vmem:[%s562_s3 + $0x20] sm:$0xff]  ;;  %605 = vst [vmem:[%s558_s20] sm:$0xff] %v604_v0  ;;  %607 = vst [vmem:[%s558_s20 + $0x8] sm:$0xff] %v606_v1  ;;  %v610_v3 = vld [vmem:[%s562_s3 + $0x30] sm:$0xff] }
  0x3b   : > { %609 = vst [vmem:[%s558_s20 + $0x10] sm:$0xff] %v608_v2  ;;  %v612_v4 = vld [vmem:[%s562_s3 + $0x40] sm:$0xff]  ;;  %v614_v5 = vld [vmem:[%s562_s3 + $0x50] sm:$0xff]  ;;  %611 = vst [vmem:[%s558_s20 + $0x18] sm:$0xff] %v610_v3 }
  0x3c   : > { %613 = vst [vmem:[%s558_s20 + $0x20] sm:$0xff] %v612_v4  ;;  %615 = vst [vmem:[%s558_s20 + $0x28] sm:$0xff] %v614_v5  ;;  %v616_v6 = vld [vmem:[%s562_s3 + $0x60] sm:$0xff]  ;;  %v618_v7 = vld [vmem:[%s562_s3 + $0x70] sm:$0xff] }
  0x3d   : > { %617 = vst [vmem:[%s558_s20 + $0x30] sm:$0xff] %v616_v6  ;;  %619 = vst [vmem:[%s558_s20 + $0x38] sm:$0xff] %v618_v7 }
  0x3e PF: > { %p2476_p1 = scmp.ge.s32.totalorder %s3257_s25, 1  ;;  %p624_p2 = scmp.lt.s32.totalorder %s3257_s25, 5 }
  0x40   : > { %p625_p3 = pnand %p2476_p1, %p624_p2 }
  0x41   : > { %s631_s15 = sand.u32 (!%p625_p3), 1, %s3233_s21   ;;  %s4155_s17 = sand.u32 (!%p625_p3), 1, %s3225_s30  }
  0x42   : > { %628 = sbr.rel (%p625_p3) target bundleno = 1496 (0x5d8), region = 122  ;;  %s2477_s28 = sshll.u32 (!%p625_p3), %s631_s15, 6 }
  0x43   : > { %s2478_s19 = sshll.u32 (!%p625_p3), %s631_s15, 7  ;;  %p692_p4 = scmp.lt.s32.totalorder (!%p625_p3), %s3245_s2, 1 }
  0x44   : > { %s3481_s16 = scalar_lea.vmem (!%p625_p3), [#allocation4], %s2477_s28  ;;  %s3483_s27 = scalar_lea.vmem (!%p625_p3), [#allocation5], %s2478_s19 }
  0x45   : > { %s3487_s29 = scalar_lea.vmem (!%p625_p3), [#allocation6], %s4155_s17  ;;  %p2479_p5 = scmp.ne.s32.totalorder (!%p625_p3), %s3241_s22, 0 }
  0x49   : > { %s3475_s3 = scalar_select %p692_p4, %s3245_s2, 1 }
  0x4a   : > { %698 = sbr.rel (%p2479_p5) target bundleno = 81 (0x51), region = 130  ;;  %vm703_vm0 = vcmask (!%p2479_p5), 7168   ;;  %v3259_v8 = vmov (!%p2479_p5), 0.0  }
  0x4b   : > { %699 = vst [vmem:[#allocation2] sm:$0xff] (!%p2479_p5), %v3259_v8  ;;  %700 = vst [vmem:[#allocation2 + $0x8] sm:$0xff] (!%p2479_p5), %v3259_v8 }
  0x4c   : > { %701 = vst [vmem:[#allocation2 + $0x10] sm:$0xff] (!%p2479_p5), %v3259_v8  ;;  %702 = vst [vmem:[#allocation2 + $0x18] sm:$0xff] (!%p2479_p5), %v3259_v8 }
  0x4d   : > { %704 = vst.msk [vmem:[#allocation3] sm:$0xff] (!%p2479_p5), %vm703_vm0, %v3259_v8  ;;  %705 = vst.msk [vmem:[#allocation3 + $0x8] sm:$0xff] (!%p2479_p5), %vm703_vm0, %v3259_v8 }
  0x4e   : > { %706 = vst.msk [vmem:[#allocation3 + $0x10] sm:$0xff] (!%p2479_p5), %vm703_vm0, %v3259_v8  ;;  %707 = vst.msk [vmem:[#allocation3 + $0x18] sm:$0xff] (!%p2479_p5), %vm703_vm0, %v3259_v8 }
  0x51 PF: > { %s4189_s28 = sld [smem:[#allocation21_spill]]  ;;  %s4190_s12 = sld [smem:[#allocation20_spill]]  ;;  %v708_v11 = vld [vmem:[%s3481_s16] sm:$0xff]  ;;  %v3260_v12 = vmov 0   ;;  %v709_v13 = vld [vmem:[%s3481_s16 + $0x8] sm:$0xff]  ;;  %v710_v15 = vld [vmem:[%s3481_s16 + $0x10] sm:$0xff] }
  0x52   : > { %3130 = vset.pattern.permute.xlu1 %v3260_v12  ;;  %3129 = vset.pattern.permute.xlu0 %v3260_v12  ;;  %v2876_v14 = vpack.c.bf16 %v709_v13, %v708_v11  ;;  %v711_v16 = vld [vmem:[%s3481_s16 + $0x18] sm:$0xff]  ;;  %v712_v20 = vld [vmem:[%s3481_s16 + $0x20] sm:$0xff]  ;;  %v713_v21 = vld [vmem:[%s3481_s16 + $0x28] sm:$0xff]  ;;  %vm732_vm1 = vcmask 523264   ;;  %s4191_s24 = sld [smem:[#allocation19_spill]]  ;;  %s4193_s5 = sld [smem:[#allocation23_spill]] }
  0x53   : > { %v2880_v19 = vpack.c.bf16 %v711_v16, %v710_v15  ;;  %v2884_v25 = vpack.c.bf16 %v713_v21, %v712_v20  ;;  %v714_v26 = vld [vmem:[%s3481_s16 + $0x30] sm:$0xff]  ;;  %v715_v27 = vld [vmem:[%s3481_s16 + $0x38] sm:$0xff]  ;;  %s4194_s6 = sld [smem:[#allocation24_spill]]  ;;  %s4195_s4 = sld [smem:[#allocation22_spill]]  ;;  %vm1921_vm2 = vcmask 7168  }
  0x54   : > { %2877 = vmatprep.subr.bf16.mxu0 %v2876_v14  ;;  %v2888_v30 = vpack.c.bf16 %v715_v27, %v714_v26  ;;  %p2496_p6 = scmp.ne.s32.totalorder %s3241_s22, 1 }
  0x55   : > { %2879 = vmatpush3.bf16.msra.mxu0 %v2876_v14  ;;  %s4196_s19 = sld [smem:[#allocation27_spill]] (!%p2496_p6)  ;;  %vm3263_vm3 = vmmov (!%p2496_p6), 0   ;;  %s4199_s15 = sld [smem:[#allocation25_spill]] (!%p2496_p6)  ;;  %vm2222_vm4 = vcmask (!%p2496_p6), 57344  }
  0x56   : > { %2881 = vmatprep.subr.bf16.mxu0 %v2880_v19  ;;  %s4200_s21 = sld [smem:[#allocation28_spill]] (!%p2496_p6)  ;;  %s4201_s26 = sld [smem:[#allocation30_spill]] (!%p2496_p6) }
  0x57   : > { %v1038_v9 = vld [vmem:[%s4189_s28] sm:$0xff]  ;;  %v1039_v17 = vld [vmem:[%s4189_s28 + $0x8] sm:$0xff]  ;;  %v929_v23 = vld [vmem:[%s4190_s12 + $0x18] sm:$0xff]  ;;  %s4202_s1 = scalar_lea.vmem (!%p2496_p6), %s4142_s18, %s3475_s3 }
  0x58   : > { %v926_v10 = vld [vmem:[%s4190_s12] sm:$0xff]  ;;  %1056 = vperm.xlu1 %3130, %v1038_v9   ;;  %v927_v18 = vld [vmem:[%s4190_s12 + $0x8] sm:$0xff]  ;;  %s4192_s13 = smov %s4191_s24  ;;  %v928_v24 = vld [vmem:[%s4190_s12 + $0x10] sm:$0xff] }
  0x59   : > { %944 = vperm.xlu0 %3129, %v926_v10   ;;  %v716_v22 = vld [vmem:[%s4191_s24] sm:$0xff]  ;;  %2883 = vmatpush3.bf16.msra.mxu0 %v2880_v19  ;;  %v1041_v28 = vld [vmem:[%s4189_s28 + $0x18] sm:$0xff]  ;;  %v1040_v29 = vld [vmem:[%s4189_s28 + $0x10] sm:$0xff] }
  0x5a   : > { %2650 = vmatprep.mubr.msk.f32.mxu0 %vm732_vm1, %v716_v22  ;;  %2885 = vmatprep.subr.bf16.mxu0 %v2884_v25  ;;  %v931_v31 = vld [vmem:[%s4190_s12 + $0x28] sm:$0xff]  ;;  %v930_v32 = vld [vmem:[%s4190_s12 + $0x20] sm:$0xff]  ;;  %v718_v34 = vld [vmem:[%s4192_s13 + $0x10] sm:$0xff] }
  0x5b   : > { %v717_v33 = vld [vmem:[%s4192_s13 + $0x8] sm:$0xff]  ;;  %v1042_v36 = vld [vmem:[%s4189_s28 + $0x20] sm:$0xff]  ;;  %v719_v37 = vld [vmem:[%s4192_s13 + $0x18] sm:$0xff] }
  0x5c   : > { %1061 = vperm.xlu1 %3130, %v1039_v17   ;;  %v1043_v35 = vld [vmem:[%s4189_s28 + $0x28] sm:$0xff]  ;;  %v720_v38 = vld [vmem:[%s4192_s13 + $0x20] sm:$0xff]  ;;  %v933_v39 = vld [vmem:[%s4190_s12 + $0x38] sm:$0xff] }
  0x5d   : > { %949 = vperm.xlu0 %3129, %v927_v18   ;;  %2887 = vmatpush3.bf16.msra.mxu0 %v2884_v25  ;;  %v932_v40 = vld [vmem:[%s4190_s12 + $0x30] sm:$0xff]  ;;  %v721_v41 = vld [vmem:[%s4192_s13 + $0x28] sm:$0xff]  ;;  %v1045_v43 = vld [vmem:[%s4189_s28 + $0x38] sm:$0xff] }
  0x5e   : > { %2889 = vmatprep.subr.bf16.mxu0 %v2888_v30  ;;  %v722_v42 = vld [vmem:[%s4192_s13 + $0x30] sm:$0xff]  ;;  %v723_v45 = vld [vmem:[%s4192_s13 + $0x38] sm:$0xff]  ;;  %v724_v46 = vld [vmem:[%s4192_s13 + $0x40] sm:$0xff] }
  0x5f   : > { %v1044_v44 = vld [vmem:[%s4189_s28 + $0x30] sm:$0xff]  ;;  %v935_v47 = vld [vmem:[%s4190_s12 + $0x48] sm:$0xff]  ;;  %v934_v48 = vld [vmem:[%s4190_s12 + $0x40] sm:$0xff] }
  0x60   : > { %959 = vperm.xlu1 %3130, %v929_v23   ;;  %v725_v49 = vld [vmem:[%s4192_s13 + $0x48] sm:$0xff]  ;;  %v726_v50 = vld [vmem:[%s4192_s13 + $0x50] sm:$0xff]  ;;  %v1046_v52 = vld [vmem:[%s4189_s28 + $0x40] sm:$0xff] }
  0x61   : > { %954 = vperm.xlu0 %3129, %v928_v24   ;;  %2891 = vmatpush3.bf16.msra.mxu0 %v2888_v30  ;;  %v1047_v51 = vld [vmem:[%s4189_s28 + $0x48] sm:$0xff]  ;;  %v727_v53 = vld [vmem:[%s4192_s13 + $0x58] sm:$0xff]  ;;  %v728_v54 = vld [vmem:[%s4192_s13 + $0x60] sm:$0xff] }
  0x62   : > { %v937_v55 = vld [vmem:[%s4190_s12 + $0x58] sm:$0xff]  ;;  %v936_v56 = vld [vmem:[%s4190_s12 + $0x50] sm:$0xff]  ;;  %v729_v57 = vld [vmem:[%s4192_s13 + $0x68] sm:$0xff] }
  0x63   : > { %v730_v58 = vld [vmem:[%s4192_s13 + $0x70] sm:$0xff]  ;;  %v1049_v59 = vld [vmem:[%s4189_s28 + $0x58] sm:$0xff]  ;;  %v939_v62 = vld [vmem:[%s4190_s12 + $0x68] sm:$0xff] }
  0x64   : > { %1071 = vperm.xlu1 %3130, %v1041_v28   ;;  %2651 = vmatmul.mubr.msk.f32.vlgmr.msra.gmra.mrb[0].mxu0 %vm732_vm1, %v717_v33  ;;  %v1048_v60 = vld [vmem:[%s4189_s28 + $0x50] sm:$0xff]  ;;  %v731_v61 = vld [vmem:[%s4192_s13 + $0x78] sm:$0xff]  ;;  %v938_v63 = vld [vmem:[%s4190_s12 + $0x60] sm:$0xff] }
  0x65   : > { %1066 = vperm.xlu0 %3129, %v1040_v29   ;;  %2653 = vmatprep.mubr.msk.f32.mxu0 %vm732_vm1, %v718_v34  ;;  %v1051_v0 = vld [vmem:[%s4189_s28 + $0x68] sm:$0xff]  ;;  %v1050_v1 = vld [vmem:[%s4189_s28 + $0x60] sm:$0xff]  ;;  %v941_v2 = vld [vmem:[%s4190_s12 + $0x78] sm:$0xff] }
  0x66   : > { %v940_v3 = vld [vmem:[%s4190_s12 + $0x70] sm:$0xff]  ;;  %v1053_v4 = vld [vmem:[%s4189_s28 + $0x78] sm:$0xff]  ;;  %v1344_v6 = vld [vmem:[%s4193_s5 + $0x8] sm:$0xff] }
  0x67   : > { %v1052_v5 = vld [vmem:[%s4189_s28 + $0x70] sm:$0xff]  ;;  %v1343_v7 = vld [vmem:[%s4193_s5] sm:$0xff]  ;;  %v1456_v8 = vld [vmem:[%s4194_s6 + $0x8] sm:$0xff] }
  0x68   : > { %969 = vperm.xlu1 %3130, %v931_v31   ;;  %2654 = vmatmul.mubr.msk.f32.gmra.mrb[2].mxu0 %vm732_vm1, %v719_v37  ;;  %v1455_v9 = vld [vmem:[%s4194_s6] sm:$0xff]  ;;  %v1346_v10 = vld [vmem:[%s4193_s5 + $0x18] sm:$0xff]  ;;  %v1345_v11 = vld [vmem:[%s4193_s5 + $0x10] sm:$0xff] }
  0x69   : > { %964 = vperm.xlu0 %3129, %v930_v32   ;;  %2656 = vmatprep.mubr.msk.f32.mxu0 %vm732_vm1, %v720_v38  ;;  %v1458_v12 = vld [vmem:[%s4194_s6 + $0x18] sm:$0xff]  ;;  %v1457_v13 = vld [vmem:[%s4194_s6 + $0x10] sm:$0xff]  ;;  %v1348_v14 = vld [vmem:[%s4193_s5 + $0x28] sm:$0xff] }
  0x6a   : > { %v1347_v15 = vld [vmem:[%s4193_s5 + $0x20] sm:$0xff]  ;;  %v1460_v16 = vld [vmem:[%s4194_s6 + $0x28] sm:$0xff]  ;;  %v1350_v18 = vld [vmem:[%s4193_s5 + $0x38] sm:$0xff] }
  0x6b   : > { %v1459_v17 = vld [vmem:[%s4194_s6 + $0x20] sm:$0xff]  ;;  %v1349_v19 = vld [vmem:[%s4193_s5 + $0x30] sm:$0xff]  ;;  %v1462_v20 = vld [vmem:[%s4194_s6 + $0x38] sm:$0xff] }
  0x6c   : > { %1081 = vperm.xlu1 %3130, %v1043_v35   ;;  %2657 = vmatmul.mubr.msk.f32.gmra.mrb[4].mxu0 %vm732_vm1, %v721_v41  ;;  %v1461_v21 = vld [vmem:[%s4194_s6 + $0x30] sm:$0xff]  ;;  %v1352_v22 = vld [vmem:[%s4193_s5 + $0x48] sm:$0xff]  ;;  %v1351_v23 = vld [vmem:[%s4193_s5 + $0x40] sm:$0xff] }
  0x6d   : > { %1076 = vperm.xlu0 %3129, %v1042_v36   ;;  %2659 = vmatprep.mubr.msk.f32.mxu0 %vm732_vm1, %v722_v42  ;;  %v1464_v24 = vld [vmem:[%s4194_s6 + $0x48] sm:$0xff]  ;;  %v1463_v25 = vld [vmem:[%s4194_s6 + $0x40] sm:$0xff]  ;;  %v1354_v26 = vld [vmem:[%s4193_s5 + $0x58] sm:$0xff] }
  0x6e   : > { %v1353_v27 = vld [vmem:[%s4193_s5 + $0x50] sm:$0xff]  ;;  %v1466_v28 = vld [vmem:[%s4194_s6 + $0x58] sm:$0xff]  ;;  %v1356_v30 = vld [vmem:[%s4193_s5 + $0x68] sm:$0xff] }
  0x6f   : > { %v1465_v29 = vld [vmem:[%s4194_s6 + $0x50] sm:$0xff]  ;;  %v1355_v31 = vld [vmem:[%s4193_s5 + $0x60] sm:$0xff]  ;;  %v1468_v32 = vld [vmem:[%s4194_s6 + $0x68] sm:$0xff] }
  0x70   : > { %979 = vperm.xlu1 %3130, %v933_v39   ;;  %2660 = vmatmul.mubr.msk.f32.gmra.mrb[6].mxu0 %vm732_vm1, %v723_v45  ;;  %v1467_v33 = vld [vmem:[%s4194_s6 + $0x60] sm:$0xff]  ;;  %v1358_v34 = vld [vmem:[%s4193_s5 + $0x78] sm:$0xff]  ;;  %v1357_v35 = vld [vmem:[%s4193_s5 + $0x70] sm:$0xff]  ;;  %s4197_s5 = sld [smem:[#allocation29_spill]] (!%p2496_p6) }
  0x71   : > { %974 = vperm.xlu0 %3129, %v932_v40   ;;  %2662 = vmatprep.mubr.msk.f32.mxu0 %vm732_vm1, %v724_v46  ;;  %v1470_v36 = vld [vmem:[%s4194_s6 + $0x78] sm:$0xff]  ;;  %v1469_v37 = vld [vmem:[%s4194_s6 + $0x70] sm:$0xff]  ;;  %v1710_v38 = vld [vmem:[%s4132_s8 + $0x8] sm:$0xff]  ;;  %s4198_s6 = sld [smem:[#allocation26_spill]] (!%p2496_p6) }
  0x72   : > { %v1709_v39 = vld [vmem:[%s4132_s8] sm:$0xff]  ;;  %v1712_v40 = vld [vmem:[%s4132_s8 + $0x18] sm:$0xff]  ;;  %v1711_v41 = vld [vmem:[%s4132_s8 + $0x10] sm:$0xff] }
  0x73   : > { %v1738_v42 = vld [vmem:[%s4133_s9 + $0x8] sm:$0xff]  ;;  %v1739_v45 = vld [vmem:[%s4133_s9 + $0x10] sm:$0xff]  ;;  %v1182_v46 = vld [vmem:[%s4195_s4] sm:$0xff] }
  0x74   : > { %1091 = vperm.xlu1 %3130, %v1045_v43   ;;  %2663 = vmatmul.mubr.msk.f32.gmra.mrb[8].mxu0 %vm732_vm1, %v725_v49  ;;  %v1737_v43 = vld [vmem:[%s4133_s9] sm:$0xff] }
  0x75   : > { %1086 = vperm.xlu0 %3129, %v1044_v44   ;;  %2665 = vmatprep.mubr.msk.f32.mxu0 %vm732_vm1, %v726_v50  ;;  %v1740_v44 = vld [vmem:[%s4133_s9 + $0x18] sm:$0xff] }
  0x78   : > { %989 = vperm.xlu1 %3130, %v935_v47   ;;  %2666 = vmatmul.mubr.msk.f32.gmra.mrb[10].mxu0 %vm732_vm1, %v727_v53 }
  0x79   : > { %984 = vperm.xlu0 %3129, %v934_v48   ;;  %2668 = vmatprep.mubr.msk.f32.mxu0 %vm732_vm1, %v728_v54 }
  0x7c   : > { %1101 = vperm.xlu1 %3130, %v1047_v51   ;;  %2669 = vmatmul.mubr.msk.f32.gmra.mrb[12].mxu0 %vm732_vm1, %v729_v57 }
  0x7d   : > { %1096 = vperm.xlu0 %3129, %v1046_v52   ;;  %2671 = vmatprep.mubr.msk.f32.mxu0 %vm732_vm1, %v730_v58 }
  0x80   : > { %999 = vperm.xlu1 %3130, %v937_v55   ;;  %2672 = vmatmul.mubr.msk.f32.gmra.mrb[14].mxu0 %vm732_vm1, %v731_v61 }
  0x81   : > { %994 = vperm.xlu0 %3129, %v936_v56   ;;  %2706 = vmatprep.mubr.f32.mxu0 %v1182_v46 }
  0x84   : > { %1111 = vperm.xlu1 %3130, %v1049_v59  }
  0x85   : > { %1106 = vperm.xlu0 %3129, %v1048_v60  }
  0x88   : > { %1009 = vperm.xlu1 %3130, %v939_v62  }
  0x89   : > { %1004 = vperm.xlu0 %3129, %v938_v63  }
  0x8c   : > { %1121 = vperm.xlu1 %3130, %v1051_v0  }
  0x8d   : > { %1116 = vperm.xlu0 %3129, %v1050_v1  }
  0x90   : > { %1019 = vperm.xlu1 %3130, %v941_v2  }
  0x91   : > { %1014 = vperm.xlu0 %3129, %v940_v3  }
  0x94   : > { %1131 = vperm.xlu1 %3130, %v1053_v4  }
  0x95   : > { %1126 = vperm.xlu0 %3129, %v1052_v5  }
  0x98   : > { %1366 = vperm.xlu1 %3130, %v1344_v6  }
  0x99   : > { %1361 = vperm.xlu0 %3129, %v1343_v7  }
  0x9c   : > { %1478 = vperm.xlu1 %3130, %v1456_v8  }
  0x9d   : > { %1473 = vperm.xlu0 %3129, %v1455_v9  }
  0xa0   : > { %1376 = vperm.xlu1 %3130, %v1346_v10  }
  0xa1   : > { %1371 = vperm.xlu0 %3129, %v1345_v11  }
  0xa4   : > { %1488 = vperm.xlu1 %3130, %v1458_v12  }
  0xa5   : > { %1483 = vperm.xlu0 %3129, %v1457_v13  }
  0xa8   : > { %1386 = vperm.xlu1 %3130, %v1348_v14  }
  0xa9   : > { %1381 = vperm.xlu0 %3129, %v1347_v15  }
  0xac   : > { %1498 = vperm.xlu1 %3130, %v1460_v16  }
  0xad   : > { %1493 = vperm.xlu0 %3129, %v1459_v17  }
  0xb0   : > { %1396 = vperm.xlu1 %3130, %v1350_v18  }
  0xb1   : > { %1391 = vperm.xlu0 %3129, %v1349_v19  }
  0xb4   : > { %1508 = vperm.xlu1 %3130, %v1462_v20  }
  0xb5   : > { %1503 = vperm.xlu0 %3129, %v1461_v21  }
  0xb8   : > { %1406 = vperm.xlu1 %3130, %v1352_v22  }
  0xb9   : > { %1401 = vperm.xlu0 %3129, %v1351_v23  }
  0xbc   : > { %1518 = vperm.xlu1 %3130, %v1464_v24  }
  0xbd   : > { %1513 = vperm.xlu0 %3129, %v1463_v25  }
  0xc0   : > { %1416 = vperm.xlu1 %3130, %v1354_v26  }
  0xc1   : > { %1411 = vperm.xlu0 %3129, %v1353_v27  }
  0xc4   : > { %1528 = vperm.xlu1 %3130, %v1466_v28  }
  0xc5   : > { %1523 = vperm.xlu0 %3129, %v1465_v29  }
  0xc8   : > { %1426 = vperm.xlu1 %3130, %v1356_v30  }
  0xc9   : > { %1421 = vperm.xlu0 %3129, %v1355_v31  }
  0xcc   : > { %1538 = vperm.xlu1 %3130, %v1468_v32  }
  0xcd   : > { %1533 = vperm.xlu0 %3129, %v1467_v33  }
  0xd0   : > { %1436 = vperm.xlu1 %3130, %v1358_v34  }
  0xd1   : > { %1431 = vperm.xlu0 %3129, %v1357_v35  }
  0xd4   : > { %1548 = vperm.xlu1 %3130, %v1470_v36  }
  0xd5   : > { %1543 = vperm.xlu0 %3129, %v1469_v37  }
  0xd7   : > { %v1057_v47 = vpop.permute.xlu1 %1056 }
  0xd8   : > { %1720 = vperm.xlu1 %3130, %v1710_v38   ;;  %v945_v48 = vpop.permute.xlu0 %944 }
  0xd9   : > { %1715 = vperm.xlu0 %3129, %v1709_v39  }
  0xdb   : > { %v1062_v49 = vpop.permute.xlu1 %1061 }
  0xdc   : > { %1730 = vperm.xlu1 %3130, %v1712_v40   ;;  %v950_v50 = vpop.permute.xlu0 %949 }
  0xdd   : > { %1725 = vperm.xlu0 %3129, %v1711_v41  }
  0xdf   : > { %v960_v51 = vpop.permute.xlu1 %959 }
  0xe0   : > { %1748 = vperm.xlu1 %3130, %v1738_v42   ;;  %v955_v52 = vpop.permute.xlu0 %954 }
  0xe1   : > { %1743 = vperm.xlu0 %3129, %v1737_v43  }
  0xe3   : > { %v1072_v53 = vpop.permute.xlu1 %1071 }
  0xe4   : > { %1758 = vperm.xlu1 %3130, %v1740_v44   ;;  %v1067_v54 = vpop.permute.xlu0 %1066 }
  0xe5   : > { %1753 = vperm.xlu0 %3129, %v1739_v45  }
  0xe7   : > { %v970_v55 = vpop.permute.xlu1 %969 }
  0xe8   : > { %v965_v56 = vpop.permute.xlu0 %964 }
  0xeb   : > { %v1082_v57 = vpop.permute.xlu1 %1081 }
  0xec   : > { %v1077_v58 = vpop.permute.xlu0 %1076 }
  0xef   : > { %v980_v59 = vpop.permute.xlu1 %979 }
  0xf0   : > { %v975_v60 = vpop.permute.xlu0 %974 }
  0xf3   : > { %v1092_v61 = vpop.permute.xlu1 %1091 }
  0xf4   : > { %v1087_v62 = vpop.permute.xlu0 %1086 }
  0xf7   : > { %v990_v63 = vpop.permute.xlu1 %989 }
  0xf8   : > { %v985_v0 = vpop.permute.xlu0 %984 }
  0xfb   : > { %v1102_v1 = vpop.permute.xlu1 %1101 }
  0xfc   : > { %v3781_v2 = vpop.permute.xlu0 %1096 }
  0xff   : > { %v3783_v3 = vpop.permute.xlu1 %999 }
 0x100   : > { %v3785_v5 = vpop.permute.xlu0 %994 }
 0x103   : > { %v1112_v15 = vpop.permute.xlu1 %1111 }
 0x104   : > { %v1107_v18 = vpop.permute.xlu0 %1106 }
 0x107   : > { %v1010_v29 = vpop.permute.xlu1 %1009 }
 0x108   : > { %v1005_v33 = vpop.permute.xlu0 %1004 }
 0x10b   : > { %v1122_v46 = vpop.permute.xlu1 %1121 }
 0x137   : > { %v2652_v4 = vpop.f32.mrb[0].mxu0 }
 0x138   : > { %v1023_v6 = vmul.f32 %v2652_v4, %v950_v50  ;;  %v847_v7 = vpop.f32.mrb[1].mxu0 }
 0x139   : > { %v1022_v8 = vmul.f32 %v945_v48, %v847_v7 }
 0x13a   : > { %v1135_v9 = vadd.f32 %v1062_v49, %v1023_v6  ;;  %v1117_v49 = vpop.permute.xlu0 %1116 }
 0x13b   : > { %v1134_v10 = vadd.f32 %v1057_v47, %v1022_v8  ;;  %v2655_v11 = vpop.f32.mrb[2].mxu0 }
 0x13c   : > { %v1151_v12 = vmax.f32 %v1135_v9, 0.0  ;;  %v1025_v13 = vmul.f32 %v2655_v11, %v960_v51  ;;  %v857_v14 = vpop.f32.mrb[3].mxu0 }
 0x13d   : > { %v1150_v16 = vmax.f32 %v1134_v10, 0.0  ;;  %v1024_v17 = vmul.f32 %v955_v52, %v857_v14 }
 0x13e   : > { %1167 = vst [vmem:[%s3483_s27 + $0x8] sm:$0xff] %v1151_v12  ;;  %v1137_v19 = vadd.f32 %v1072_v53, %v1025_v13 }
 0x13f   : > { %1166 = vst [vmem:[%s3483_s27] sm:$0xff] %v1150_v16  ;;  %v1136_v20 = vadd.f32 %v1067_v54, %v1024_v17  ;;  %v2658_v21 = vpop.f32.mrb[4].mxu0  ;;  %v2892_v22 = vpack.c.bf16 %v1151_v12, %v1150_v16 }
 0x140   : > { %v1153_v23 = vmax.f32 %v1137_v19, 0.0  ;;  %v1027_v24 = vmul.f32 %v2658_v21, %v970_v55  ;;  %v867_v25 = vpop.f32.mrb[5].mxu0 }
 0x141   : > { %v1152_v26 = vmax.f32 %v1136_v20, 0.0  ;;  %v1026_v27 = vmul.f32 %v965_v56, %v867_v25  ;;  %2893 = vmatprep.subr.bf16.mxu0 %v2892_v22  ;;  %v1185_v25 = vld [vmem:[%s4195_s4 + $0x18] sm:$0xff] }
 0x142   : > { %1169 = vst [vmem:[%s3483_s27 + $0x18] sm:$0xff] %v1153_v23  ;;  %v1139_v28 = vadd.f32 %v1082_v57, %v1027_v24  ;;  %2895 = vmatpush3.bf16.msra.mxu0 %v2892_v22  ;;  %v1184_v24 = vld [vmem:[%s4195_s4 + $0x10] sm:$0xff] }
 0x143   : > { %1168 = vst [vmem:[%s3483_s27 + $0x10] sm:$0xff] %v1152_v26  ;;  %v1138_v30 = vadd.f32 %v1077_v58, %v1026_v27  ;;  %v2661_v31 = vpop.f32.mrb[6].mxu0  ;;  %v2896_v32 = vpack.c.bf16 %v1153_v23, %v1152_v26  ;;  %v1183_v23 = vld [vmem:[%s4195_s4 + $0x8] sm:$0xff]  ;;  %v1186_v26 = vld [vmem:[%s4195_s4 + $0x20] sm:$0xff] }
 0x144   : > { %v1155_v34 = vmax.f32 %v1139_v28, 0.0  ;;  %v1029_v35 = vmul.f32 %v2661_v31, %v980_v59  ;;  %v877_v36 = vpop.f32.mrb[7].mxu0  ;;  %v1187_v27 = vld [vmem:[%s4195_s4 + $0x28] sm:$0xff]  ;;  %v1188_v28 = vld [vmem:[%s4195_s4 + $0x30] sm:$0xff] }
 0x145   : > { %v1154_v37 = vmax.f32 %v1138_v30, 0.0  ;;  %v1028_v38 = vmul.f32 %v975_v60, %v877_v36  ;;  %2897 = vmatprep.subr.bf16.mxu0 %v2896_v32  ;;  %v1020_v60 = vpop.permute.xlu1 %1019  ;;  %v1190_v30 = vld [vmem:[%s4195_s4 + $0x40] sm:$0xff]  ;;  %v1191_v31 = vld [vmem:[%s4195_s4 + $0x48] sm:$0xff]  ;;  %v1196_v36 = vld [vmem:[%s4195_s4 + $0x70] sm:$0xff] }
 0x146   : > { %1171 = vst [vmem:[%s3483_s27 + $0x28] sm:$0xff] %v1155_v34  ;;  %v1141_v39 = vadd.f32 %v1092_v61, %v1029_v35  ;;  %2899 = vmatpush3.bf16.msra.mxu0 %v2896_v32  ;;  %v1192_v32 = vld [vmem:[%s4195_s4 + $0x50] sm:$0xff]  ;;  %v1195_v35 = vld [vmem:[%s4195_s4 + $0x68] sm:$0xff] }
 0x147   : > { %1170 = vst [vmem:[%s3483_s27 + $0x20] sm:$0xff] %v1154_v37  ;;  %v1140_v40 = vadd.f32 %v1087_v62, %v1028_v38  ;;  %v2664_v41 = vpop.f32.mrb[8].mxu0  ;;  %v2900_v42 = vpack.c.bf16 %v1155_v34, %v1154_v37  ;;  %v1194_v34 = vld [vmem:[%s4195_s4 + $0x60] sm:$0xff]  ;;  %v1197_v37 = vld [vmem:[%s4195_s4 + $0x78] sm:$0xff] }
 0x148   : > { %v1157_v43 = vmax.f32 %v1141_v39, 0.0  ;;  %v1031_v44 = vmul.f32 %v2664_v41, %v990_v63  ;;  %v887_v45 = vpop.f32.mrb[9].mxu0  ;;  %v1620_v38 = vld [vmem:[%s4131_s7] sm:$0xff] }
 0x149   : > { %v1156_v47 = vmax.f32 %v1140_v40, 0.0  ;;  %v1030_v48 = vmul.f32 %v985_v0, %v887_v45  ;;  %2901 = vmatprep.subr.bf16.mxu0 %v2900_v42  ;;  %v1015_v0 = vpop.permute.xlu0 %1014  ;;  %v1132_v13 = vpop.permute.xlu1 %1131 }
 0x14a   : > { %1173 = vst [vmem:[%s3483_s27 + $0x38] sm:$0xff] %v1157_v43  ;;  %v1143_v50 = vadd.f32 %v1102_v1, %v1031_v44  ;;  %2903 = vmatpush3.bf16.msra.mxu0 %v2900_v42 }
 0x14b   : > { %1172 = vst [vmem:[%s3483_s27 + $0x30] sm:$0xff] %v1156_v47  ;;  %v1142_v51 = vadd.f32 %v3781_v2, %v1030_v48  ;;  %v2667_v52 = vpop.f32.mrb[10].mxu0  ;;  %v2904_v53 = vpack.c.bf16 %v1157_v43, %v1156_v47 }
 0x14c   : > { %v1159_v54 = vmax.f32 %v1143_v50, 0.0  ;;  %v1033_v55 = vmul.f32 %v2667_v52, %v3783_v3  ;;  %v897_v56 = vpop.f32.mrb[11].mxu0 }
 0x14d   : > { %v1158_v57 = vmax.f32 %v1142_v51, 0.0  ;;  %v1032_v58 = vmul.f32 %v3785_v5, %v897_v56  ;;  %2905 = vmatprep.subr.bf16.mxu0 %v2904_v53  ;;  %v1127_v16 = vpop.permute.xlu0 %1126  ;;  %v1367_v39 = vpop.permute.xlu1 %1366 }
 0x14e   : > { %1175 = vst [vmem:[%s3483_s27 + $0x48] sm:$0xff] %v1159_v54  ;;  %v1145_v59 = vadd.f32 %v1112_v15, %v1033_v55  ;;  %2907 = vmatpush3.bf16.msra.mxu0 %v2904_v53 }
 0x14f   : > { %1174 = vst [vmem:[%s3483_s27 + $0x40] sm:$0xff] %v1158_v57  ;;  %v1144_v61 = vadd.f32 %v1107_v18, %v1032_v58  ;;  %v2670_v62 = vpop.f32.mrb[12].mxu0  ;;  %v2908_v63 = vpack.c.bf16 %v1159_v54, %v1158_v57 }
 0x150   : > { %v1161_v1 = vmax.f32 %v1145_v59, 0.0  ;;  %v1035_v2 = vmul.f32 %v2670_v62, %v1010_v29  ;;  %v907_v4 = vpop.f32.mrb[13].mxu0  ;;  %v1189_v29 = vld [vmem:[%s4195_s4 + $0x38] sm:$0xff] }
 0x151   : > { %v1160_v3 = vmax.f32 %v1144_v61, 0.0  ;;  %v1034_v6 = vmul.f32 %v1005_v33, %v907_v4  ;;  %2909 = vmatprep.subr.bf16.mxu0 %v2908_v63  ;;  %v1193_v33 = vld [vmem:[%s4195_s4 + $0x58] sm:$0xff]  ;;  %v1362_v40 = vpop.permute.xlu0 %1361  ;;  %v1479_v41 = vpop.permute.xlu1 %1478 }
 0x152   : > { %1177 = vst [vmem:[%s3483_s27 + $0x58] sm:$0xff] %v1161_v1  ;;  %v1147_v5 = vadd.f32 %v1122_v46, %v1035_v2  ;;  %2911 = vmatpush3.bf16.msra.mxu0 %v2908_v63 }
 0x153   : > { %1176 = vst [vmem:[%s3483_s27 + $0x50] sm:$0xff] %v1160_v3  ;;  %v1146_v7 = vadd.f32 %v1117_v49, %v1034_v6  ;;  %v2673_v8 = vpop.f32.mrb[14].mxu0  ;;  %v2912_v9 = vpack.c.bf16 %v1161_v1, %v1160_v3 }
 0x154   : > { %v1163_v10 = vmax.f32 %v1147_v5, 0.0  ;;  %v1037_v11 = vmul.f32 %v2673_v8, %v1020_v60  ;;  %v917_v12 = vpop.f32.mrb[15].mxu0 }
 0x155   : > { %v1162_v14 = vmax.f32 %v1146_v7, 0.0  ;;  %v1036_v15 = vmul.f32 %v1015_v0, %v917_v12  ;;  %2913 = vmatprep.subr.bf16.mxu0 %v2912_v9  ;;  %v1474_v42 = vpop.permute.xlu0 %1473  ;;  %v1377_v43 = vpop.permute.xlu1 %1376 }
 0x156   : > { %1179 = vst [vmem:[%s3483_s27 + $0x68] sm:$0xff] %v1163_v10  ;;  %v1149_v17 = vadd.f32 %v1132_v13, %v1037_v11  ;;  %2915 = vmatpush3.bf16.msra.mxu0 %v2912_v9 }
 0x157   : > { %1178 = vst [vmem:[%s3483_s27 + $0x60] sm:$0xff] %v1162_v14  ;;  %v1148_v18 = vadd.f32 %v1127_v16, %v1036_v15  ;;  %v2916_v19 = vpack.c.bf16 %v1163_v10, %v1162_v14 }
 0x158   : > { %v1165_v20 = vmax.f32 %v1149_v17, 0.0 }
 0x159   : > { %v1164_v21 = vmax.f32 %v1148_v18, 0.0  ;;  %2917 = vmatprep.subr.bf16.mxu0 %v2916_v19  ;;  %v1372_v44 = vpop.permute.xlu0 %1371  ;;  %v1489_v45 = vpop.permute.xlu1 %1488 }
 0x15a   : > { %1181 = vst [vmem:[%s3483_s27 + $0x78] sm:$0xff] %v1165_v20  ;;  %2919 = vmatpush3.bf16.msra.mxu0 %v2916_v19 }
 0x15b   : > { %1180 = vst [vmem:[%s3483_s27 + $0x70] sm:$0xff] %v1164_v21  ;;  %v2920_v22 = vpack.c.bf16 %v1165_v20, %v1164_v21 }
 0x15d   : > { %2921 = vmatprep.subr.bf16.mxu0 %v2920_v22  ;;  %v1484_v46 = vpop.permute.xlu0 %1483  ;;  %v1387_v47 = vpop.permute.xlu1 %1386 }
 0x15e   : > { %2923 = vmatpush3.bf16.msra.mxu0 %v2920_v22 }
 0x161   : > { %2707 = vmatmul.mubr.f32.vlgmr.msra.gmra.mrb[16].mxu0 %v1183_v23  ;;  %v1382_v48 = vpop.permute.xlu0 %1381  ;;  %v1499_v49 = vpop.permute.xlu1 %1498 }
 0x162   : > { %2709 = vmatprep.mubr.f32.mxu0 %v1184_v24 }
 0x165   : > { %2710 = vmatmul.mubr.f32.gmra.mrb[18].mxu0 %v1185_v25  ;;  %v1494_v50 = vpop.permute.xlu0 %1493  ;;  %v1397_v51 = vpop.permute.xlu1 %1396 }
 0x166   : > { %2712 = vmatprep.mubr.f32.mxu0 %v1186_v26 }
 0x169   : > { %2713 = vmatmul.mubr.f32.gmra.mrb[20].mxu0 %v1187_v27  ;;  %v1392_v52 = vpop.permute.xlu0 %1391  ;;  %v1509_v53 = vpop.permute.xlu1 %1508 }
 0x16a   : > { %2715 = vmatprep.mubr.f32.mxu0 %v1188_v28 }
 0x16d   : > { %2716 = vmatmul.mubr.f32.gmra.mrb[22].mxu0 %v1189_v29  ;;  %v1504_v54 = vpop.permute.xlu0 %1503  ;;  %v1407_v55 = vpop.permute.xlu1 %1406 }
 0x16e   : > { %2718 = vmatprep.mubr.f32.mxu0 %v1190_v30 }
 0x171   : > { %2719 = vmatmul.mubr.f32.gmra.mrb[24].mxu0 %v1191_v31  ;;  %v3854_v56 = vpop.permute.xlu0 %1401  ;;  %v3856_v57 = vpop.permute.xlu1 %1518 }
 0x172   : > { %2721 = vmatprep.mubr.f32.mxu0 %v1192_v32 }
 0x175   : > { %2722 = vmatmul.mubr.f32.gmra.mrb[26].mxu0 %v1193_v33  ;;  %v3858_v58 = vpop.permute.xlu0 %1513  ;;  %v3860_v59 = vpop.permute.xlu1 %1416 }
 0x176   : > { %2724 = vmatprep.mubr.f32.mxu0 %v1194_v34 }
 0x179   : > { %2725 = vmatmul.mubr.f32.gmra.mrb[28].mxu0 %v1195_v35  ;;  %v3862_v61 = vpop.permute.xlu0 %1411  ;;  %v3864_v7 = vpop.permute.xlu1 %1528 }
 0x17a   : > { %2727 = vmatprep.mubr.f32.mxu0 %v1196_v36 }
 0x17d   : > { %2728 = vmatmul.mubr.f32.gmra.mrb[30].mxu0 %v1197_v37  ;;  %v3866_v10 = vpop.permute.xlu0 %1523  ;;  %v1427_v24 = vpop.permute.xlu1 %1426 }
 0x17e   : > { %2762 = vmatprep.mubr.f32.mxu0 %v1620_v38 }
 0x181   : > { %v1422_v29 = vpop.permute.xlu0 %1421 }
 0x234   : > { %v2708_v60 = vpop.f32.mrb[16].mxu0 }
 0x235   : > { %v1440_v62 = vmul.f32 %v2708_v60, %v1367_v39  ;;  %v1264_v63 = vpop.f32.mrb[17].mxu0 }
 0x236   : > { %v1439_v0 = vmul.f32 %v1362_v40, %v1264_v63 }
 0x237   : > { %v1552_v1 = vadd.f32 %v1479_v41, %v1440_v62 }
 0x238   : > { %v1551_v2 = vadd.f32 %v1474_v42, %v1439_v0  ;;  %v2711_v4 = vpop.f32.mrb[18].mxu0 }
 0x239   : > { %v1568_v3 = vmax.f32 %v1552_v1, 0.0  ;;  %v1442_v6 = vmul.f32 %v2711_v4, %v1377_v43  ;;  %v1274_v5 = vpop.f32.mrb[19].mxu0 }
 0x23a   : > { %v1567_v8 = vmax.f32 %v1551_v2, 0.0  ;;  %v1441_v9 = vmul.f32 %v1372_v44, %v1274_v5 }
 0x23b   : > { %v1584_v11 = vmul.f32 %v1568_v3, %v1568_v3  ;;  %v1554_v12 = vadd.f32 %v1489_v45, %v1442_v6 }
 0x23c   : > { %v1583_v13 = vmul.f32 %v1567_v8, %v1567_v8  ;;  %v2924_v14 = vpack.c.bf16 %v1568_v3, %v1567_v8  ;;  %v1553_v15 = vadd.f32 %v1484_v46, %v1441_v9  ;;  %v2714_v16 = vpop.f32.mrb[20].mxu0  ;;  %v1539_v46 = vpop.permute.xlu1 %1538 }
 0x23d   : > { %v1570_v17 = vmax.f32 %v1554_v12, 0.0  ;;  %v1444_v18 = vmul.f32 %v2714_v16, %v1387_v47  ;;  %v1284_v19 = vpop.f32.mrb[21].mxu0 }
 0x23e   : > { %v1599_v20 = vadd.f32 %v1584_v11, %v1583_v13  ;;  %v1569_v21 = vmax.f32 %v1553_v15, 0.0  ;;  %v1443_v22 = vmul.f32 %v1382_v48, %v1284_v19  ;;  %2925 = vmatprep.subr.bf16.mxu0 %v2924_v14  ;;  %2957 = vmatprep.subr.bf16.mxu1 %v2924_v14 }
 0x23f   : > { %v1556_v23 = vadd.f32 %v1499_v49, %v1444_v18  ;;  %2927 = vmatpush3.bf16.msra.mxu0 %v2924_v14  ;;  %2959 = vmatpush3.bf16.xpose.msra.mxu1 %v2924_v14  ;;  %v1586_v33 = vmul.f32 %v1570_v17, %v1570_v17 }
 0x240   : > { %v1585_v25 = vmul.f32 %v1569_v21, %v1569_v21  ;;  %v2928_v26 = vpack.c.bf16 %v1570_v17, %v1569_v21  ;;  %v1555_v27 = vadd.f32 %v1494_v50, %v1443_v22  ;;  %v2717_v28 = vpop.f32.mrb[22].mxu0  ;;  %v1437_v6 = vpop.permute.xlu1 %1436 }
 0x241   : > { %v1572_v30 = vmax.f32 %v1556_v23, 0.0  ;;  %v1446_v31 = vmul.f32 %v2717_v28, %v1397_v51  ;;  %v1294_v32 = vpop.f32.mrb[23].mxu0  ;;  %v1534_v51 = vpop.permute.xlu0 %1533 }
 0x242   : > { %v1600_v34 = vadd.f32 %v1599_v20, %v1585_v25  ;;  %v1571_v35 = vmax.f32 %v1555_v27, 0.0  ;;  %v1445_v36 = vmul.f32 %v1392_v52, %v1294_v32  ;;  %2929 = vmatprep.subr.bf16.mxu0 %v2928_v26  ;;  %2961 = vmatprep.subr.bf16.mxu1 %v2928_v26 }
 0x243   : > { %v1558_v37 = vadd.f32 %v1509_v53, %v1446_v31  ;;  %2931 = vmatpush3.bf16.msra.mxu0 %v2928_v26  ;;  %v1588_v47 = vmul.f32 %v1572_v30, %v1572_v30 }
 0x244   : > { %v1587_v38 = vmul.f32 %v1571_v35, %v1571_v35  ;;  %v1601_v39 = vadd.f32 %v1600_v34, %v1586_v33  ;;  %v2932_v40 = vpack.c.bf16 %v1572_v30, %v1571_v35  ;;  %v1557_v41 = vadd.f32 %v1504_v54, %v1445_v36  ;;  %v2720_v42 = vpop.f32.mrb[24].mxu0 }
 0x245   : > { %v1574_v43 = vmax.f32 %v1558_v37, 0.0  ;;  %v1448_v44 = vmul.f32 %v2720_v42, %v1407_v55  ;;  %v1304_v45 = vpop.f32.mrb[25].mxu0  ;;  %v1432_v12 = vpop.permute.xlu0 %1431 }
 0x246   : > { %v1602_v48 = vadd.f32 %v1601_v39, %v1587_v38  ;;  %v1573_v49 = vmax.f32 %v1557_v41, 0.0  ;;  %v1447_v50 = vmul.f32 %v3854_v56, %v1304_v45  ;;  %2933 = vmatprep.subr.bf16.mxu0 %v2932_v40  ;;  %v1621_v45 = vld [vmem:[%s4131_s7 + $0x8] sm:$0xff] }
 0x247   : > { %v1560_v52 = vadd.f32 %v3856_v57, %v1448_v44  ;;  %2935 = vmatpush3.bf16.msra.mxu0 %v2932_v40  ;;  %2963 = vmatpush3.bf16.xpose.msra.mxu1 %v2928_v26  ;;  %v1590_v2 = vmul.f32 %v1574_v43, %v1574_v43  ;;  %v1549_v26 = vpop.permute.xlu1 %1548 }
 0x248   : > { %v1589_v53 = vmul.f32 %v1573_v49, %v1573_v49  ;;  %v1603_v60 = vadd.f32 %v1602_v48, %v1588_v47  ;;  %v2936_v62 = vpack.c.bf16 %v1574_v43, %v1573_v49  ;;  %v1559_v54 = vadd.f32 %v3858_v58, %v1447_v50  ;;  %v2723_v63 = vpop.f32.mrb[26].mxu0  ;;  %2965 = vmatprep.subr.bf16.mxu1 %v2932_v40  ;;  %v1622_v47 = vld [vmem:[%s4131_s7 + $0x10] sm:$0xff]  ;;  %v1623_v48 = vld [vmem:[%s4131_s7 + $0x18] sm:$0xff] }
 0x249   : > { %v1576_v55 = vmax.f32 %v1560_v52, 0.0  ;;  %v1450_v0 = vmul.f32 %v2723_v63, %v3860_v59  ;;  %v1314_v1 = vpop.f32.mrb[27].mxu0 }
 0x24a   : > { %v1604_v4 = vadd.f32 %v1603_v60, %v1589_v53  ;;  %v1575_v56 = vmax.f32 %v1559_v54, 0.0  ;;  %v1449_v3 = vmul.f32 %v3862_v61, %v1314_v1  ;;  %2937 = vmatprep.subr.bf16.mxu0 %v2936_v62 }
 0x24b   : > { %v1562_v57 = vadd.f32 %v3864_v7, %v1450_v0  ;;  %2939 = vmatpush3.bf16.msra.mxu0 %v2936_v62  ;;  %v1592_v15 = vmul.f32 %v1576_v55, %v1576_v55  ;;  %v1721_v53 = vpop.permute.xlu1 %1720 }
 0x24c   : > { %v1591_v5 = vmul.f32 %v1575_v56, %v1575_v56  ;;  %v1605_v8 = vadd.f32 %v1604_v4, %v1590_v2  ;;  %v2940_v9 = vpack.c.bf16 %v1576_v55, %v1575_v56  ;;  %v1561_v58 = vadd.f32 %v3866_v10, %v1449_v3  ;;  %v2726_v11 = vpop.f32.mrb[28].mxu0 }
 0x24d   : > { %v1578_v13 = vmax.f32 %v1562_v57, 0.0  ;;  %v1452_v59 = vmul.f32 %v2726_v11, %v1427_v24  ;;  %v1324_v14 = vpop.f32.mrb[29].mxu0 }
 0x24e   : > { %v1606_v16 = vadd.f32 %v1605_v8, %v1591_v5  ;;  %v1577_v17 = vmax.f32 %v1561_v58, 0.0  ;;  %v1451_v18 = vmul.f32 %v1422_v29, %v1324_v14  ;;  %2941 = vmatprep.subr.bf16.mxu0 %v2940_v9  ;;  %v1544_v29 = vpop.permute.xlu0 %1543 }
 0x24f   : > { %v1564_v61 = vadd.f32 %v1539_v46, %v1452_v59  ;;  %2943 = vmatpush3.bf16.msra.mxu0 %v2940_v9  ;;  %2967 = vmatpush3.bf16.xpose.msra.mxu1 %v2932_v40  ;;  %v1594_v24 = vmul.f32 %v1578_v13, %v1578_v13  ;;  %v1731_v54 = vpop.permute.xlu1 %1730 }
 0x250   : > { %v1593_v7 = vmul.f32 %v1577_v17, %v1577_v17  ;;  %v1607_v19 = vadd.f32 %v1606_v16, %v1592_v15  ;;  %v2944_v20 = vpack.c.bf16 %v1578_v13, %v1577_v17  ;;  %v1563_v21 = vadd.f32 %v1534_v51, %v1451_v18  ;;  %v2729_v22 = vpop.f32.mrb[30].mxu0  ;;  %2969 = vmatprep.subr.bf16.mxu1 %v2936_v62 }
 0x251   : > { %v1580_v10 = vmax.f32 %v1564_v61, 0.0  ;;  %v1454_v23 = vmul.f32 %v2729_v22, %v1437_v6  ;;  %v1334_v25 = vpop.f32.mrb[31].mxu0 }
 0x252   : > { %v1608_v27 = vadd.f32 %v1607_v19, %v1593_v7  ;;  %v1579_v28 = vmax.f32 %v1563_v21, 0.0  ;;  %v1453_v30 = vmul.f32 %v1432_v12, %v1334_v25  ;;  %2945 = vmatprep.subr.bf16.mxu0 %v2944_v20  ;;  %v1716_v60 = vpop.permute.xlu0 %1715 }
 0x253   : > { %v1566_v31 = vadd.f32 %v1549_v26, %v1454_v23  ;;  %2947 = vmatpush3.bf16.msra.mxu0 %v2944_v20  ;;  %v1596_v37 = vmul.f32 %v1580_v10, %v1580_v10  ;;  %v1749_v1 = vpop.permute.xlu1 %1748 }
 0x254   : > { %v1595_v32 = vmul.f32 %v1579_v28, %v1579_v28  ;;  %v1609_v33 = vadd.f32 %v1608_v27, %v1594_v24  ;;  %v2948_v34 = vpack.c.bf16 %v1580_v10, %v1579_v28  ;;  %v1565_v35 = vadd.f32 %v1544_v29, %v1453_v30 }
 0x255   : > { %v1582_v36 = vmax.f32 %v1566_v31, 0.0 }
 0x256   : > { %v1610_v38 = vadd.f32 %v1609_v33, %v1595_v32  ;;  %v1581_v39 = vmax.f32 %v1565_v35, 0.0  ;;  %2949 = vmatprep.subr.bf16.mxu0 %v2948_v34  ;;  %v1726_v63 = vpop.permute.xlu0 %1725 }
 0x257   : > { %2951 = vmatpush3.bf16.msra.mxu0 %v2948_v34  ;;  %2971 = vmatpush3.bf16.xpose.msra.mxu1 %v2936_v62  ;;  %v1598_v43 = vmul.f32 %v1582_v36, %v1582_v36  ;;  %v1759_v12 = vpop.permute.xlu1 %1758 }
 0x258   : > { %v1597_v40 = vmul.f32 %v1581_v39, %v1581_v39  ;;  %v1611_v41 = vadd.f32 %v1610_v38, %v1596_v37  ;;  %v2952_v42 = vpack.c.bf16 %v1582_v36, %v1581_v39  ;;  %2973 = vmatprep.subr.bf16.mxu1 %v2940_v9 }
 0x25a   : > { %v1612_v44 = vadd.f32 %v1611_v41, %v1597_v40  ;;  %2953 = vmatprep.subr.bf16.mxu0 %v2952_v42  ;;  %v1744_v4 = vpop.permute.xlu0 %1743 }
 0x25b   : > { %2955 = vmatpush3.bf16.msra.mxu0 %v2952_v42 }
 0x25c   : > { %v1613_v46 = vadd.f32 %v1612_v44, %v1598_v43 }
 0x25e   : > { %2763 = vmatmul.mubr.f32.vlgmr.msra.gmra.mrb[32].mxu0 %v1621_v45  ;;  %v1614_v49 = vrot.slane %v1613_v46, 4  ;;  %v1754_v14 = vpop.permute.xlu0 %1753 }
 0x25f   : > { %2975 = vmatpush3.bf16.xpose.msra.mxu1 %v2940_v9  ;;  %2765 = vmatprep.mubr.f32.mxu0 %v1622_v47 }
 0x260   : > { %2977 = vmatprep.subr.bf16.mxu1 %v2944_v20  ;;  %v1615_v50 = vadd.f32 %v1614_v49, %v1613_v46 }
 0x262   : > { %2766 = vmatmul.mubr.f32.gmra.mrb[34].mxu0 %v1623_v48  ;;  %v1616_v51 = vrot.slane %v1615_v50, 2 }
 0x264   : > { %v1617_v52 = vadd.f32 %v1616_v51, %v1615_v50 }
 0x266   : > { %v1618_v62 = vrot.slane %v1617_v52, 1 }
 0x267   : > { %2979 = vmatpush3.bf16.xpose.msra.mxu1 %v2944_v20 }
 0x268   : > { %2981 = vmatprep.subr.bf16.mxu1 %v2948_v34  ;;  %v1619_v55 = vadd.f32 %v1618_v62, %v1617_v52  ;;  %v1905_v62 = vld [vmem:[#allocation3] sm:$0xff] }
 0x26a   : > { %v1734_v0 = vmul.f32 %v1721_v53, %v1619_v55  ;;  %v1733_v2 = vmul.f32 %v1716_v60, %v1619_v55  ;;  %v1736_v5 = vmul.f32 %v1731_v54, %v1619_v55  ;;  %v1735_v58 = vmul.f32 %v1726_v63, %v1619_v55  ;;  %v1906_v60 = vld [vmem:[#allocation3 + $0x8] sm:$0xff] }
 0x26c   : > { %v1762_v3 = vadd.f32 %v1749_v1, %v1734_v0  ;;  %v1761_v8 = vadd.f32 %v1744_v4, %v1733_v2  ;;  %v1764_v15 = vadd.f32 %v1759_v12, %v1736_v5  ;;  %v1763_v61 = vadd.f32 %v1754_v14, %v1735_v58  ;;  %v1907_v1 = vld [vmem:[#allocation3 + $0x10] sm:$0xff]  ;;  %v1808_v5 = vld [vmem:[#allocation2] sm:$0xff]  ;;  %v1811_v12 = vld [vmem:[#allocation2 + $0x18] sm:$0xff] }
 0x26f   : > { %2983 = vmatpush3.bf16.xpose.msra.mxu1 %v2948_v34 }
 0x270   : > { %2985 = vmatprep.subr.bf16.mxu1 %v2952_v42 }
 0x277   : > { %2987 = vmatpush3.bf16.xpose.msra.mxu1 %v2952_v42 }
 0x331   : > { %v2764_v56 = vpop.f32.mrb[32].mxu0 }
 0x332   : > { %v1766_v57 = vmul.f32 2.0, %v2764_v56  ;;  %v1690_v6 = vpop.f32.mrb[33].mxu0  ;;  %v1908_v56 = vld [vmem:[#allocation3 + $0x18] sm:$0xff] }
 0x333   : > { %v1765_v9 = vmul.f32 2.0, %v1690_v6  ;;  %v1809_v6 = vld [vmem:[#allocation2 + $0x8] sm:$0xff] }
 0x334   : > { %v1770_v11 = vsub.f32 %v1762_v3, %v1766_v57 }
 0x335   : > { %v1769_v13 = vsub.f32 %v1761_v8, %v1765_v9  ;;  %v2767_v59 = vpop.f32.mrb[34].mxu0 }
 0x336   : > { %v1768_v16 = vmul.f32 2.0, %v2767_v59  ;;  %v1700_v17 = vpop.f32.mrb[35].mxu0 }
 0x337   : > { %v1773_v18 = vmax.f32 %v1769_v13, %v1770_v11  ;;  %v1767_v7 = vmul.f32 2.0, %v1700_v17 }
 0x338   : > { %v1772_v19 = vsub.f32 %v1764_v15, %v1768_v16 }
 0x339   : > { %v1771_v20 = vsub.f32 %v1763_v61, %v1767_v7  ;;  %v3261_v61 = vmov (!%p2496_p6), 0  }
 0x33a   : > { %3142 = vset.pattern.permute.xlu1 (!%p2496_p6), %v3261_v61  ;;  %3141 = vset.pattern.permute.xlu0 (!%p2496_p6), %v3261_v61  ;;  %v1939_v61 = vld [vmem:[%s4199_s15 + $0x8] sm:$0xff] (!%p2496_p6) }
 0x33b   : > { %v1774_v21 = vmax.f32 %v1771_v20, %v1772_v19 }
 0x33d   : > { %v1775_v22 = vmax.f32 %v1773_v18, %v1774_v21  ;;  %v1970_v21 = vld [vmem:[%s4135_s11] sm:$0xff] (!%p2496_p6) }
 0x33f   : > { %v1776_v10 = vrot.slane %v1775_v22, 4 }
 0x341   : > { %v1777_v23 = vmax.f32 %v1775_v22, %v1776_v10  ;;  %v2041_v22 = vld [vmem:[%s4196_s19] sm:$0xff] (!%p2496_p6)  ;;  %v2042_v10 = vld [vmem:[%s4196_s19 + $0x8] sm:$0xff] (!%p2496_p6) }
 0x343   : > { %v1778_v25 = vrot.slane %v1777_v23, 2 }
 0x345   : > { %v1779_v26 = vmax.f32 %v1777_v23, %v1778_v25  ;;  %v2135_v23 = vld [vmem:[%s4197_s5] sm:$0xff] (!%p2496_p6) }
 0x346   : > { %v1998_v25 = vld [vmem:[%s4198_s6] sm:$0xff] (!%p2496_p6) }
 0x347   : > { %v1780_v24 = vrot.slane %v1779_v26, 1 }
 0x349   : > { %v1781_v27 = vmax.f32 %v1779_v26, %v1780_v24  ;;  %v1972_v26 = vld [vmem:[%s4135_s11 + $0x10] sm:$0xff] (!%p2496_p6)  ;;  %v3262_v24 = vmov (!%p2496_p6), 0.0|0.0  }
 0x34a   : > { %2988 = vmatprep.subr.bf16.mxu0 (!%p2496_p6), %v3262_v24  ;;  %3012 = vmatprep.subr.bf16.mxu1 (!%p2496_p6), %v3262_v24 }
 0x34b   : > { %v1782_v28 = vsub.f32 %v1769_v13, %v1781_v27  ;;  %v1784_v30 = vsub.f32 %v1771_v20, %v1781_v27  ;;  %v1785_v29 = vsub.f32 %v1772_v19, %v1781_v27  ;;  %v1783_v31 = vsub.f32 %v1770_v11, %v1781_v27  ;;  %v1810_v13 = vld [vmem:[#allocation2 + $0x10] sm:$0xff]  ;;  %v1971_v20 = vld [vmem:[%s4135_s11 + $0x8] sm:$0xff] (!%p2496_p6) }
 0x34c   : > { %v2989_v27 = vpack.c.bf16 (!%p2496_p6), %v2042_v10, %v2041_v22 }
 0x34d   : > { %v1786_v32 = vmul.f32 1.442695, %v1782_v28  ;;  %v1788_v33 = vmul.f32 1.442695, %v1783_v31  ;;  %v1790_v34 = vmul.f32 1.442695, %v1784_v30 }
 0x34e   : > { %v1792_v35 = vmul.f32 1.442695, %v1785_v29  ;;  %v2136_v28 = vld [vmem:[%s4197_s5 + $0x8] sm:$0xff] (!%p2496_p6)  ;;  %2990 = vmatpush3.bf16.msra.mxu0 (!%p2496_p6), %v2989_v27  ;;  %v2043_v29 = vld [vmem:[%s4196_s19 + $0x10] sm:$0xff] (!%p2496_p6)  ;;  %v2044_v31 = vld [vmem:[%s4196_s19 + $0x18] sm:$0xff] (!%p2496_p6) }
 0x34f   : > { %3131 = vpow2.f32 %v1786_v32  ;;  %v3013_v30 = vpack.c.bf16 (!%p2496_p6), %v2136_v28, %v2135_v23  ;;  %v2137_v32 = vld [vmem:[%s4197_s5 + $0x10] sm:$0xff] (!%p2496_p6)  ;;  %2991 = vmatprep.subr.bf16.mxu0 (!%p2496_p6), %v3262_v24 }
 0x350   : > { %3133 = vpow2.f32 %v1788_v33  ;;  %v1973_v33 = vld [vmem:[%s4135_s11 + $0x18] sm:$0xff] (!%p2496_p6) }
 0x351   : > { %3135 = vpow2.f32 %v1790_v34  ;;  %v1999_v34 = vld [vmem:[%s4198_s6 + $0x8] sm:$0xff] (!%p2496_p6) }
 0x352   : > { %3137 = vpow2.f32 %v1792_v35  ;;  %v2992_v35 = vpack.c.bf16 (!%p2496_p6), %v2044_v31, %v2043_v29 }
 0x354   : > { %2993 = vmatpush3.bf16.msra.mxu0 (!%p2496_p6), %v2992_v35 }
 0x355   : > { %2994 = vmatprep.subr.bf16.mxu0 (!%p2496_p6), %v3262_v24 }
 0x359   : > { %v3132_v36 = vpop.eup %3131 }
 0x35a   : > { %v3134_v37 = vpop.eup %3133 }
 0x35b   : > { %v1794_v38 = vadd.f32 %v3134_v37, %v3132_v36  ;;  %v3136_v39 = vpop.eup %3135 }
 0x35c   : > { %v3138_v41 = vpop.eup %3137 }
 0x35d   : > { %v1795_v40 = vadd.f32 %v3136_v39, %v1794_v38  ;;  %v2045_v38 = vld [vmem:[%s4196_s19 + $0x20] sm:$0xff] (!%p2496_p6) }
 0x35f   : > { %v1796_v42 = vadd.f32 %v3138_v41, %v1795_v40  ;;  %v2139_v40 = vld [vmem:[%s4197_s5 + $0x20] sm:$0xff] (!%p2496_p6) }
 0x361   : > { %v1797_v43 = vrot.slane %v1796_v42, 4 }
 0x363   : > { %v1798_v44 = vadd.f32 %v1797_v43, %v1796_v42  ;;  %v2000_v42 = vld [vmem:[%s4198_s6 + $0x10] sm:$0xff] (!%p2496_p6) }
 0x365   : > { %v1799_v45 = vrot.slane %v1798_v44, 2 }
 0x367   : > { %v1800_v46 = vadd.f32 %v1799_v45, %v1798_v44  ;;  %v2140_v44 = vld [vmem:[%s4197_s5 + $0x28] sm:$0xff] (!%p2496_p6) }
 0x368   : > { %v3019_v45 = vpack.c.bf16 (!%p2496_p6), %v2140_v44, %v2139_v40 }
 0x369   : > { %v1801_v47 = vrot.slane %v1800_v46, 1 }
 0x36b   : > { %v1802_v48 = vadd.f32 %v1801_v47, %v1800_v46  ;;  %v2047_v46 = vld [vmem:[%s4196_s19 + $0x30] sm:$0xff] (!%p2496_p6)  ;;  %v2048_v47 = vld [vmem:[%s4196_s19 + $0x38] sm:$0xff] (!%p2496_p6) }
 0x36d   : > { %3139 = vrcp.f32 %v1802_v48  ;;  %v2141_v48 = vld [vmem:[%s4197_s5 + $0x30] sm:$0xff] (!%p2496_p6) }
 0x377   : > { %v3140_v49 = vpop.eup %3139 }
 0x378   : > { %v1805_v50 = vmul.f32 %v3140_v49, %v3134_v37  ;;  %v1804_v51 = vmul.f32 %v3140_v49, %v3132_v36  ;;  %v1806_v52 = vmul.f32 %v3140_v49, %v3136_v39  ;;  %v1807_v53 = vmul.f32 %v3140_v49, %v3138_v41  ;;  %v2138_v36 = vld [vmem:[%s4197_s5 + $0x18] sm:$0xff] (!%p2496_p6)  ;;  %v2046_v39 = vld [vmem:[%s4196_s19 + $0x28] sm:$0xff] (!%p2496_p6) }
 0x379   : > { %v3016_v37 = vpack.c.bf16 (!%p2496_p6), %v2138_v36, %v2137_v32  ;;  %v2001_v41 = vld [vmem:[%s4198_s6 + $0x18] sm:$0xff] (!%p2496_p6)  ;;  %v2995_v43 = vpack.c.bf16 (!%p2496_p6), %v2046_v39, %v2045_v38  ;;  %v2998_v49 = vpack.c.bf16 (!%p2496_p6), %v2048_v47, %v2047_v46 }
 0x37a   : > { %1911 = vadd.xlane.f32.xlu1 %v1805_v50  ;;  %1909 = vadd.xlane.f32.xlu0 %v1804_v51 }
 0x37b   : > { %2800 = vmatprep.mubr.f32.mxu1 %v1804_v51  ;;  %2996 = vmatpush3.bf16.msra.mxu0 (!%p2496_p6), %v2995_v43 }
 0x37c   : > { %2801 = vmatmul.mubr.f32.vlgmr.msra.gmra.mrb[0].mxu1 %v1805_v50  ;;  %2997 = vmatprep.subr.bf16.mxu0 (!%p2496_p6), %v3262_v24  ;;  %v2142_v50 = vld [vmem:[%s4197_s5 + $0x38] sm:$0xff] (!%p2496_p6) }
 0x37d   : > { %2803 = vmatprep.mubr.f32.mxu1 %v1806_v52  ;;  %3014 = vmatpush3.bf16.msra.mxu1 (!%p2496_p6), %v3013_v30  ;;  %v3022_v51 = vpack.c.bf16 (!%p2496_p6), %v2142_v50, %v2141_v48 }
 0x37e   : > { %1913 = vadd.xlane.f32.xlu0 %v1806_v52  ;;  %3015 = vmatprep.subr.bf16.mxu1 (!%p2496_p6), %v3262_v24  ;;  %v2049_v52 = vld [vmem:[%s4196_s19 + $0x40] sm:$0xff] (!%p2496_p6) }
 0x37f   : > { %2999 = vmatpush3.bf16.msra.mxu0 (!%p2496_p6), %v2998_v49 }
 0x380   : > { %2804 = vmatmul.mubr.f32.gmra.mrb[2].mxu1 %v1807_v53  ;;  %3000 = vmatprep.subr.bf16.mxu0 (!%p2496_p6), %v3262_v24 }
 0x381   : > { %3017 = vmatpush3.bf16.msra.mxu1 (!%p2496_p6), %v3016_v37 }
 0x382   : > { %1915 = vadd.xlane.f32.xlu0 %v1807_v53  ;;  %3018 = vmatprep.subr.bf16.mxu1 (!%p2496_p6), %v3262_v24  ;;  %v2050_v53 = vld [vmem:[%s4196_s19 + $0x48] sm:$0xff] (!%p2496_p6) }
 0x385   : > { %3020 = vmatpush3.bf16.msra.mxu1 (!%p2496_p6), %v3019_v45 }
 0x386   : > { %3021 = vmatprep.subr.bf16.mxu1 (!%p2496_p6), %v3262_v24 }
 0x389   : > { %3023 = vmatpush3.bf16.msra.mxu1 (!%p2496_p6), %v3022_v51 }
 0x38a   : > { %3024 = vmatprep.subr.bf16.mxu1 (!%p2496_p6), %v3262_v24 }
 0x407   : > { %v1912_v54 = vpop.xlane.xlu1 %1911  ;;  %v1910_v63 = vpop.xlane.xlu0 %1909 }
 0x408   : > { %v1918_v55 = vadd.f32 %v1912_v54, %v1906_v60  ;;  %v1917_v0 = vadd.f32 %v1910_v63, %v1905_v62  ;;  %v2143_v60 = vld [vmem:[%s4197_s5 + $0x40] sm:$0xff] (!%p2496_p6)  ;;  %v3001_v62 = vpack.c.bf16 (!%p2496_p6), %v2050_v53, %v2049_v52  ;;  %v2144_v54 = vld [vmem:[%s4197_s5 + $0x48] sm:$0xff] (!%p2496_p6) }
 0x409   : > { %v3025_v63 = vpack.c.bf16 (!%p2496_p6), %v2144_v54, %v2143_v60 }
 0x40a   : > { %1923 = vst.msk [vmem:[#allocation3 + $0x8] sm:$0xff] %vm1921_vm2, %v1918_v55  ;;  %1922 = vst.msk [vmem:[#allocation3] sm:$0xff] %vm1921_vm2, %v1917_v0  ;;  %3002 = vmatpush3.bf16.msra.mxu0 (!%p2496_p6), %v3001_v62  ;;  %v2051_v55 = vld [vmem:[%s4196_s19 + $0x50] sm:$0xff] (!%p2496_p6)  ;;  %v2052_v0 = vld [vmem:[%s4196_s19 + $0x58] sm:$0xff] (!%p2496_p6) }
 0x40b   : > { %v1914_v2 = vpop.xlane.xlu0 %1913  ;;  %3003 = vmatprep.subr.bf16.mxu0 (!%p2496_p6), %v3262_v24  ;;  %3026 = vmatpush3.bf16.msra.mxu1 (!%p2496_p6), %v3025_v63 }
 0x40c   : > { %v1919_v4 = vadd.f32 %v1914_v2, %v1907_v1  ;;  %v2145_v1 = vld [vmem:[%s4197_s5 + $0x50] sm:$0xff] (!%p2496_p6)  ;;  %v3004_v2 = vpack.c.bf16 (!%p2496_p6), %v2052_v0, %v2051_v55  ;;  %3027 = vmatprep.subr.bf16.mxu1 (!%p2496_p6), %v3262_v24 }
 0x40e   : > { %1924 = vst.msk [vmem:[#allocation3 + $0x10] sm:$0xff] %vm1921_vm2, %v1919_v4  ;;  %v2146_v4 = vld [vmem:[%s4197_s5 + $0x58] sm:$0xff] (!%p2496_p6)  ;;  %3005 = vmatpush3.bf16.msra.mxu0 (!%p2496_p6), %v3004_v2 }
 0x40f   : > { %v1916_v3 = vpop.xlane.xlu0 %1915  ;;  %3006 = vmatprep.subr.bf16.mxu0 (!%p2496_p6), %v3262_v24 }
 0x410   : > { %v1920_v57 = vadd.f32 %v1916_v3, %v1908_v56  ;;  %v3028_v56 = vpack.c.bf16 (!%p2496_p6), %v2146_v4, %v2145_v1  ;;  %v2053_v3 = vld [vmem:[%s4196_s19 + $0x60] sm:$0xff] (!%p2496_p6) }
 0x411   : > { %v1934_v18 = vld [vmem:[#allocation3] sm:$0xff] (!%p2496_p6)  ;;  %v1935_v19 = vld [vmem:[#allocation3 + $0x8] sm:$0xff] (!%p2496_p6) }
 0x412   : > { %1925 = vst.msk [vmem:[#allocation3 + $0x18] sm:$0xff] %vm1921_vm2, %v1920_v57  ;;  %1944 = vperm.xlu0 (!%p2496_p6), %3141, %v1934_v18   ;;  %v2054_v57 = vld [vmem:[%s4196_s19 + $0x68] sm:$0xff] (!%p2496_p6)  ;;  %3029 = vmatpush3.bf16.msra.mxu1 (!%p2496_p6), %v3028_v56  ;;  %v2057_v56 = vld [vmem:[%s4200_s21] sm:$0x1] (!%p2496_p6) }
 0x413   : > { %3030 = vmatprep.subr.bf16.mxu1 (!%p2496_p6), %v3262_v24 }
 0x415   : > { %v1936_v17 = vld [vmem:[#allocation3 + $0x10] sm:$0xff] (!%p2496_p6) }
 0x416   : > { %1954 = vperm.xlu1 (!%p2496_p6), %3142, %v1936_v17   ;;  %1949 = vperm.xlu0 (!%p2496_p6), %3141, %v1935_v19   ;;  %v1938_v19 = vld [vmem:[%s4199_s15] sm:$0xff] (!%p2496_p6) }
 0x419   : > { %v1937_v7 = vld [vmem:[#allocation3 + $0x18] sm:$0xff] (!%p2496_p6) }
 0x41a   : > { %1959 = vperm.xlu1 (!%p2496_p6), %3142, %v1937_v7   ;;  %1976 = vperm.xlu0 (!%p2496_p6), %3141, %v1970_v21  }
 0x41e   : > { %1981 = vperm.xlu1 (!%p2496_p6), %3142, %v1971_v20   ;;  %1986 = vperm.xlu0 (!%p2496_p6), %3141, %v1972_v26   ;;  %v1941_v26 = vld [vmem:[%s4199_s15 + $0x18] sm:$0xff] (!%p2496_p6) }
 0x422   : > { %2004 = vperm.xlu1 (!%p2496_p6), %3142, %v1998_v25   ;;  %2009 = vperm.xlu0 (!%p2496_p6), %3141, %v1999_v34   ;;  %v1940_v25 = vld [vmem:[%s4199_s15 + $0x10] sm:$0xff] (!%p2496_p6) }
 0x426   : > { %1991 = vperm.xlu1 (!%p2496_p6), %3142, %v1973_v33   ;;  %2014 = vperm.xlu0 (!%p2496_p6), %3141, %v2000_v42  }
 0x42a   : > { %2019 = vperm.xlu1 (!%p2496_p6), %3142, %v2001_v41  }
 0x44f   : > { %v2802_v8 = vpop.f32.mrb[0].mxu1 }
 0x450   : > { %v1898_v9 = vadd.f32 %v2802_v8, %v1809_v6  ;;  %v1878_v58 = vpop.f32.mrb[1].mxu1  ;;  %v2147_v6 = vld [vmem:[%s4197_s5 + $0x60] sm:$0xff] (!%p2496_p6)  ;;  %v2148_v8 = vld [vmem:[%s4197_s5 + $0x68] sm:$0xff] (!%p2496_p6) }
 0x451   : > { %v1897_v11 = vadd.f32 %v1878_v58, %v1808_v5  ;;  %1929 = sbr.rel (%p2496_p6) target bundleno = 1455 (0x5af), region = 134  ;;  %v3007_v5 = vpack.c.bf16 (!%p2496_p6), %v2054_v57, %v2053_v3  ;;  %v2055_v58 = vld [vmem:[%s4196_s19 + $0x70] sm:$0xff] (!%p2496_p6)  ;;  %v2151_v3 = vld [vmem:[%s4201_s26] sm:$0x1] (!%p2496_p6) }
 0x452   : > { %1902 = vst [vmem:[#allocation2 + $0x8] sm:$0xff] %v1898_v9  ;;  %v3264_v9 = vmov (!%p2496_p6), 0.0  }
 0x453   : > { %1901 = vst [vmem:[#allocation2] sm:$0xff] %v1897_v11  ;;  %v2805_v59 = vpop.f32.mrb[2].mxu1  ;;  %2838 = vmatprep.mubr.msk.f32.mxu0 (!%p2496_p6), %vm3263_vm3, %v3264_v9  ;;  %v2056_v11 = vld [vmem:[%s4196_s19 + $0x78] sm:$0xff] (!%p2496_p6)  ;;  %2873 = vmatprep.mubr.msk.f32.mxu1 (!%p2496_p6), %vm3263_vm3, %v3264_v9 }
 0x454   : > { %v1900_v14 = vadd.f32 %v2805_v59, %v1811_v12  ;;  %v1888_v15 = vpop.f32.mrb[3].mxu1  ;;  %v3031_v12 = vpack.c.bf16 (!%p2496_p6), %v2148_v8, %v2147_v6  ;;  %v2150_v59 = vld [vmem:[%s4197_s5 + $0x78] sm:$0xff] (!%p2496_p6)  ;;  %3008 = vmatpush3.bf16.msra.mxu0 (!%p2496_p6), %v3007_v5 }
 0x455   : > { %v1899_v16 = vadd.f32 %v1888_v15, %v1810_v13  ;;  %v2149_v13 = vld [vmem:[%s4197_s5 + $0x70] sm:$0xff] (!%p2496_p6)  ;;  %3009 = vmatprep.subr.bf16.mxu0 (!%p2496_p6), %v3262_v24 }
 0x456   : > { %1904 = vst [vmem:[#allocation2 + $0x18] sm:$0xff] %v1900_v14  ;;  %v3010_v14 = vpack.c.bf16 (!%p2496_p6), %v2056_v11, %v2055_v58  ;;  %3032 = vmatpush3.bf16.msra.mxu1 (!%p2496_p6), %v3031_v12  ;;  %v3034_v15 = vpack.c.bf16 (!%p2496_p6), %v2150_v59, %v2149_v13 }
 0x457   : > { %1903 = vst [vmem:[#allocation2 + $0x10] sm:$0xff] %v1899_v16  ;;  %3033 = vmatprep.subr.bf16.mxu1 (!%p2496_p6), %v3262_v24 }
 0x458   : > { %3011 = vmatpush3.bf16.msra.mxu0 %v3010_v14 }
 0x459   : > { %v1931_v22 = vld [vmem:[#allocation2 + $0x8] sm:$0xff] }
 0x45a   : > { %3035 = vmatpush3.bf16.msra.mxu1 %v3034_v15  ;;  %v1930_v24 = vld [vmem:[#allocation2] sm:$0xff] }
 0x45d   : > { %v1933_v34 = vld [vmem:[#allocation2 + $0x18] sm:$0xff] }
 0x45e   : > { %v1932_v33 = vld [vmem:[#allocation2 + $0x10] sm:$0xff] }
 0x491   : > { %v1945_v17 = vpop.permute.xlu0 %1944 }
 0x492   : > { %v1962_v23 = vmul.f32 %v1945_v17, %v1938_v19 }
 0x494   : > { %v1966_v32 = vsub.f32 %v1930_v24, %v1962_v23 }
 0x495   : > { %v1955_v16 = vpop.permute.xlu1 %1954  ;;  %v1950_v7 = vpop.permute.xlu0 %1949 }
 0x496   : > { %v1963_v20 = vmul.f32 %v1950_v7, %v1939_v61  ;;  %v1964_v29 = vmul.f32 %v1955_v16, %v1940_v25 }
 0x498   : > { %v1967_v27 = vsub.f32 %v1931_v22, %v1963_v20  ;;  %v1968_v40 = vsub.f32 %v1932_v33, %v1964_v29 }
 0x499   : > { %v1960_v18 = vpop.permute.xlu1 %1959  ;;  %v1977_v10 = vpop.permute.xlu0 %1976 }
 0x49a   : > { %v1965_v31 = vmul.f32 %v1960_v18, %v1941_v26  ;;  %v1994_v36 = vmul.f32 %v1977_v10, %v1966_v32 }
 0x49c   : > { %v1969_v41 = vsub.f32 %v1933_v34, %v1965_v31 }
 0x49d   : > { %v1982_v21 = vpop.permute.xlu1 %1981  ;;  %v1987_v30 = vpop.permute.xlu0 %1986 }
 0x49e   : > { %v1995_v35 = vmul.f32 %v1982_v21, %v1967_v27  ;;  %v1996_v43 = vmul.f32 %v1987_v30, %v1968_v40 }
 0x4a1   : > { %v2005_v28 = vpop.permute.xlu1 %2004  ;;  %v2010_v38 = vpop.permute.xlu0 %2009 }
 0x4a2   : > { %v2022_v39 = vadd.f32 %v2005_v28, %v1994_v36  ;;  %v2023_v42 = vadd.f32 %v2010_v38, %v1995_v35 }
 0x4a4   : > { %v2027_v45 = vmax.f32 %v2023_v42, 0.0  ;;  %v2026_v48 = vmax.f32 %v2022_v39, 0.0 }
 0x4a5   : > { %v1992_v37 = vpop.permute.xlu1 %1991  ;;  %v2015_v47 = vpop.permute.xlu0 %2014 }
 0x4a6   : > { %v1997_v44 = vmul.f32 %v1992_v37, %v1969_v41  ;;  %v2024_v50 = vadd.f32 %v2015_v47, %v1996_v43  ;;  %v2030_v51 = vadd.f32 %v2027_v45, %v2026_v48 }
 0x4a8   : > { %v2028_v52 = vmax.f32 %v2024_v50, 0.0 }
 0x4a9   : > { %v2020_v46 = vpop.permute.xlu1 %2019 }
 0x4aa   : > { %v2025_v49 = vadd.f32 %v2020_v46, %v1997_v44  ;;  %v2031_v60 = vadd.f32 %v2030_v51, %v2028_v52 }
 0x4ac   : > { %v2029_v53 = vmax.f32 %v2025_v49, 0.0 }
 0x4ae   : > { %v2032_v62 = vadd.f32 %v2031_v60, %v2029_v53 }
 0x4b0   : > { %v2033_v54 = vrot.slane %v2032_v62, 4 }
 0x4b2   : > { %v2034_v63 = vadd.f32 %v2033_v54, %v2032_v62 }
 0x4b4   : > { %v2035_v55 = vrot.slane %v2034_v63, 2 }
 0x4b6   : > { %v2036_v0 = vadd.f32 %v2035_v55, %v2034_v63 }
 0x4b8   : > { %v2037_v1 = vrot.slane %v2036_v0, 1 }
 0x4ba   : > { %v2038_v2 = vadd.f32 %v2037_v1, %v2036_v0 }
 0x4bc   : > { %v2040_v4 = vmul.f32 0.03125, %v2038_v2 }
 0x4be   : > { %2839 = vmatmul.mubr.f32.vlgmr.msra.gmra.mrb[0].mxu0 %v2040_v4  ;;  %2874 = vmatmul.mubr.f32.vlgmr.msra.gmra.mrb[0].mxu1 %v2040_v4 }
 0x591   : > { %v2124_v57 = vpop.f32.mrb[0].mxu0  ;;  %v2218_v6 = vpop.f32.mrb[0].mxu1 }
 0x592   : > { %v2125_v5 = vadd.f32 %v2124_v57, %v2057_v56  ;;  %v2219_v8 = vadd.f32 %v2218_v6, %v2151_v3  ;;  %v2840_v9 = vpop.f32.mrb[1].mxu0  ;;  %v2875_v58 = vpop.f32.mrb[1].mxu1 }
 0x594   : > { %v2497_v11 = vmul.f32 -1.442695, %v2125_v5  ;;  %2223 = vst.msk [vmem:[%s3487_s29] sm:$0x1] %vm2222_vm4, %v2219_v8 }
 0x596   : > { %3143 = vpow2.f32 %v2497_v11 }
 0x5a0   : > { %v3144_v12 = vpop.eup %3143 }
 0x5a1   : > { %v2131_v13 = vadd.f32 1.0, %v3144_v12 }
 0x5a3   : > { %3145 = vrcp.f32 %v2131_v13 }
 0x5ad   : > { %v3146_v59 = vpop.eup %3145 }
 0x5ae   : > { %2134 = vst [vmem:[%s4202_s1] sm:$0x1] %v3146_v59 }
 0x5af PF: > { %s4203_s23 = sand.u32 1, %s3225_s30   ;;  %2237 = sbr.rel (!%p3438_p7) target bundleno = 1472 (0x5c0), region = 138  ;;  %v2299_v14 = vld [vmem:[%s3483_s27] sm:$0xff] (%p3438_p7)  ;;  %v2301_v15 = vld [vmem:[%s3483_s27 + $0x8] sm:$0xff] (%p3438_p7)  ;;  %v2303_v16 = vld [vmem:[%s3483_s27 + $0x10] sm:$0xff] (%p3438_p7) }
 0x5b0   : > { %s4047_s20 = scalar_lea.sflag [#allocation7], %s4203_s23  ;;  %s2499_s3 = sshll.u32 (%p3438_p7), %s3245_s2, 5  ;;  %v2305_v17 = vld [vmem:[%s3483_s27 + $0x18] sm:$0xff] (%p3438_p7)  ;;  %v2307_v18 = vld [vmem:[%s3483_s27 + $0x20] sm:$0xff] (%p3438_p7)  ;;  %v2309_v61 = vld [vmem:[%s3483_s27 + $0x28] sm:$0xff] (%p3438_p7) }
 0x5b1   : > { %s2239_s14 = sadd.s32 (%p3438_p7), %s3241_s22, %s2499_s3  ;;  %v2311_v7 = vld [vmem:[%s3483_s27 + $0x30] sm:$0xff] (%p3438_p7)  ;;  %v2313_v19 = vld [vmem:[%s3483_s27 + $0x38] sm:$0xff] (%p3438_p7)  ;;  %v2315_v20 = vld [vmem:[%s3483_s27 + $0x40] sm:$0xff] (%p3438_p7)  ;;  %s4204_s26 = sld [smem:[#allocation31_spill]] (%p3438_p7) }
 0x5b2   : > { %s2500_s21 = sshll.u32 (%p3438_p7), %s2239_s14, 3  ;;  %v2317_v21 = vld [vmem:[%s3483_s27 + $0x48] sm:$0xff] (%p3438_p7)  ;;  %v2319_v22 = vld [vmem:[%s3483_s27 + $0x50] sm:$0xff] (%p3438_p7)  ;;  %v2321_v10 = vld [vmem:[%s3483_s27 + $0x58] sm:$0xff] (%p3438_p7) }
 0x5b3   : > { %v2323_v23 = vld [vmem:[%s3483_s27 + $0x60] sm:$0xff] (%p3438_p7)  ;;  %v2325_v25 = vld [vmem:[%s3483_s27 + $0x68] sm:$0xff] (%p3438_p7)  ;;  %v2327_v26 = vld [vmem:[%s3483_s27 + $0x70] sm:$0xff] (%p3438_p7) }
 0x5b4   : > { %v2329_v24 = vld [vmem:[%s3483_s27 + $0x78] sm:$0xff] (%p3438_p7) }
 0x5b7   : > { %s2241_s4 = scalar_lea.vmem %s4204_s26, %s2500_s21 }
 0x5b8   : > { %2300 = vst [vmem:[%s2241_s4] sm:$0xff] %v2299_v14  ;;  %2302 = vst [vmem:[%s2241_s4 + $0x10] sm:$0xff] %v2301_v15 }
 0x5b9   : > { %2304 = vst [vmem:[%s2241_s4 + $0x20] sm:$0xff] %v2303_v16  ;;  %2306 = vst [vmem:[%s2241_s4 + $0x30] sm:$0xff] %v2305_v17 }
 0x5ba   : > { %2308 = vst [vmem:[%s2241_s4 + $0x40] sm:$0xff] %v2307_v18  ;;  %2310 = vst [vmem:[%s2241_s4 + $0x50] sm:$0xff] %v2309_v61 }
 0x5bb   : > { %2312 = vst [vmem:[%s2241_s4 + $0x60] sm:$0xff] %v2311_v7  ;;  %2314 = vst [vmem:[%s2241_s4 + $0x70] sm:$0xff] %v2313_v19 }
 0x5bc   : > { %2316 = vst [vmem:[%s2241_s4 + $0x80] sm:$0xff] %v2315_v20  ;;  %2318 = vst [vmem:[%s2241_s4 + $0x90] sm:$0xff] %v2317_v21 }
 0x5bd   : > { %2320 = vst [vmem:[%s2241_s4 + $0xa0] sm:$0xff] %v2319_v22  ;;  %2322 = vst [vmem:[%s2241_s4 + $0xb0] sm:$0xff] %v2321_v10 }
 0x5be   : > { %2324 = vst [vmem:[%s2241_s4 + $0xc0] sm:$0xff] %v2323_v23  ;;  %2326 = vst [vmem:[%s2241_s4 + $0xd0] sm:$0xff] %v2325_v25 }
 0x5bf   : > { %2328 = vst [vmem:[%s2241_s4 + $0xe0] sm:$0xff] %v2327_v26  ;;  %2330 = vst [vmem:[%s2241_s4 + $0xf0] sm:$0xff] %v2329_v24 }
 0x5c0 PF: > { %s2501_s22 = sshll.u32 %s3245_s2, 4  ;;  %s2346_s24 = sshll.u32 %s3487_s29, 4  ;;  %s2347_s24 = int_to_ptr.vmem [resolvable:$true] %s2346_s24 }
 0x5c1   : > { %s4205_s3 = sld [smem:[#allocation32_spill]]  ;;  %s3147_s21 = scalar_lea.vmem %s2347_s24, 16 }
 0x5c2   : > { %p3148_p7 = scmp.ne.s32.totalorder %s2347_s24, %s3147_s21  ;;  %s3265_s17 = smov [#allocation6]  }
 0x5c3   : > { %s3151_s16 = sshll.u32 %s3265_s17, 4  ;;  %s3152_s16 = int_to_ptr.vmem [resolvable:$false] %s3151_s16 }
 0x5c4   : > { %p3149_p9 = pnand %p3148_p7, %p3442_p8  ;;  %s3153_s27 = scalar_lea.vmem %s3152_s16, 32 }
 0x5c5   : > { %p3154_p11 = scmp.lt.s32.totalorder %s2347_s24, %s3152_s16  ;;  %p3155_p12 = scmp.lt.s32.totalorder %s3153_s27, %s3147_s21 }
 0x5c6   : > { %p3150_p10 = pneg %p3149_p9 }
 0x5c7   : > { %s2344_s14 = scalar_lea.hbm %s4205_s3, %s2501_s22  ;;  %p3156_p0 = por %p3155_p12, %p3154_p11 }
 0x5c9   : > { %p3157_p1 = pnand %p3156_p0, %p3150_p10 }
 0x5cb   : > { %3160 = shalt.err (!%p3157_p1)
}
 0x5cc   : > { %s3161_s2 = scalar_lea.hbm %s2344_s14, 16  ;;  %s3165_s4 = scalar_lea.hbm %s4205_s3, 32 }
 0x5cd   : > { %p3162_p2 = scmp.ne.s32.totalorder %s2344_s14, %s3161_s2  ;;  %p3166_p5 = scmp.lt.u32.totalorder %s2344_s14, %s4205_s3 }
 0x5ce   : > { %p3167_p6 = scmp.lt.u32.totalorder %s3165_s4, %s3161_s2  ;;  %p3169_p9 = scmp.lt.u32.totalorder %s3161_s2, %s2344_s14 }
 0x5cf   : > { %p3163_p3 = pnand %p3162_p2, %p3442_p8 }
 0x5d0   : > { %p3168_p7 = por %p3167_p6, %p3166_p5 }
 0x5d1   : > { %p3164_p4 = pneg %p3163_p3 }
 0x5d2   : > { %p3170_p11 = por %p3169_p9, %p3168_p7 }
 0x5d4   : > { %p3171_p10 = pnand %p3170_p11, %p3164_p4 }
 0x5d6   : > { %3174 = shalt.err (!%p3171_p10)
}
 0x5d7   : > { %3036 = dma.vmem_to_hbm [thread:$0]  (%p3442_p8), %s2347_s24, 16, %s2344_s14, %s4047_s20  }
 0x5d8 PF: > { %p3042_p12 = scmp.ge.s32.totalorder %s3257_s25, 2  ;;  %s2371_s21 = sand.u32 1, %s3221_s0  }
 0x5d9   : > { %s2372_s17 = scalar_lea.sflag [#allocation7], %s2371_s21 }
 0x5da   : > { %p3039_p0 = pnand %p3042_p12, %p3456_p13 }
 0x5dc   : > { %3216 = dma.done.wait (!%p3039_p0), %s2372_s17, 16  }
 0x5dd   : > { %3218 = vsyncadd (!%p3039_p0), %s2372_s17, 4294967280  ;;  %s33_s25 = sadd.s32 1, %s3257_s25   ;;  %s4207_s16 = sld [smem:[#allocation9_spill]] }
 0x5de   : > { %p30_p1 = scmp.ge.s32.totalorder %s33_s25, 6   ;;  %s4208_s20 = sld [smem:[#allocation15_spill]] }
 0x5df   : > { %s4209_s21 = sld [smem:[#allocation10_spill]]  ;;  %s4210_s1 = sld [smem:[#allocation16_spill]] }
 0x5e0   : > { %s4211_s22 = sld [smem:[#allocation11_spill]]  ;;  %s4212_s2 = sld [smem:[#allocation12_spill]] }
 0x5e1   : > { %s4213_s23 = sld [smem:[#allocation13_spill]]  ;;  %s4214_s24 = sld [smem:[#allocation14_spill]] }
 0x5e2   : > { %s4215_s0 = smov %s3225_s30  ;;  %32 = sbr.rel (!%p30_p1) target bundleno = 22 (0x16), region = 236 }
 0x5e3   : > { %s4216_s30 = smov %s4207_s16 }
 0x5e9   :  { %2376 = vsyncpa [#allocation7], 1 }
 0x5ea   :  { %2378 = vsyncpa [#allocation7 + $0x1], 1 }

</bundles_post_ra>
